<compile_context>
chip_gen: v7x
topology: tpu7x:2x2x1
jax: 0.10.0
libtpu: 0.0.40
codegen_flags: <defaults>
</compile_context>

<pallas_src>
import functools

import jax
import jax.numpy as jnp
from jax.experimental import pallas as pl
from jax.experimental.pallas import tpu as pltpu

LN_EPS = 1e-5
LANE = 128
SUBLANE = 8


def _round_up(x, m):
    return (x + m - 1) // m * m


# --------------------------------------------------------------------------- #
# Kernel
# --------------------------------------------------------------------------- #
def dqn_memory_kernel(x_ref, w1_ref, wh_ref, w3_ref, pb_ref, b3_ref, o_ref,
                      *, hidden, nlayers):
    """One (TB, *) batch tile through the whole network.

    x_ref : (TB, inp_pad)       f32 input tile (true input lanes only)
    w1_ref: (inp_pad, Dh)       weight dtype (bf16), zero-padded cols
    wh_ref: (nlayers, Dh, Dh)   weight dtype, zero-padded
    w3_ref: (Dh, Dout)          weight dtype, zero-padded
    pb_ref: (rows, Dh)          f32: row 0=b1, 1..nl=bh, nl+1..2nl=gamma,
                                2nl+1..3nl=beta (padded lanes are 0)
    b3_ref: (1, Dout)           f32 output bias; padded lanes = -1e30
    o_ref : (TB, Dout)          softmax probs in first `out` lanes, 0 elsewhere
    """
    wdt = w1_ref.dtype
    inv_h = 1.0 / float(hidden)

    # Layer 1 + ReLU.  Padded cols of W1 / lanes of b1 are 0, so padded lanes of
    # o are exactly 0 (keeps full-lane LN sums equal to true-lane sums).
    o = jnp.dot(x_ref[...].astype(wdt), w1_ref[...],
                preferred_element_type=jnp.float32)
    o = jnp.maximum(o + pb_ref[0:1, :], 0.0)

    # Hidden blocks: Linear -> residual (dropout = identity in eval) -> LayerNorm.
    for i in range(nlayers):  # static unroll
        t = jnp.dot(o.astype(wdt), wh_ref[i],
                    preferred_element_type=jnp.float32)
        o = o + t + pb_ref[1 + i:2 + i, :]
        # One-pass variance; padded lanes of o are exactly 0, so dividing the
        # full-lane sums by the TRUE hidden width gives the exact moments.
        s1 = jnp.sum(o, axis=-1, keepdims=True)
        s2 = jnp.sum(o * o, axis=-1, keepdims=True)
        mu = s1 * inv_h
        var = jnp.maximum(s2 * inv_h - mu * mu, 0.0)   # clamp -> no rsqrt NaN
        o = (o - mu) * jax.lax.rsqrt(var + LN_EPS)
        # gamma/beta padded lanes are 0 -> padded lanes return to exactly 0.
        g = pb_ref[1 + nlayers + i:2 + nlayers + i, :]
        b = pb_ref[1 + 2 * nlayers + i:2 + 2 * nlayers + i, :]
        o = o * g + b

    # Output layer + softmax (padded logits are -1e30 via b3 -> exp() == 0).
    logits = jnp.dot(o.astype(wdt), w3_ref[...],
                     preferred_element_type=jnp.float32)
    logits = logits + b3_ref[...]
    m = jnp.max(logits, axis=-1, keepdims=True)
    e = jnp.exp(logits - m)
    denom = jnp.sum(e, axis=-1, keepdims=True)
    # EUP approx reciprocal; Newton refinement dropped (pure VALU filler for
    # accuracy softmax probabilities do not need).
    o_ref[...] = e * pl.reciprocal(denom, approx=True)


# --------------------------------------------------------------------------- #
# One-time parameter packing (NOT in the per-call hot path)
# --------------------------------------------------------------------------- #
def prepare_params(w1, b1, wh, bh, gamma, beta, w3, b3,
                   weight_dtype=jnp.bfloat16):
    """Pack PyTorch-layout parameters into lane-dense, VMEM-friendly slabs.

    Call once at model init; the result is reused by every forward call.
    """
    w1 = jnp.asarray(w1, jnp.float32)
    wh = jnp.asarray(wh, jnp.float32)
    w3 = jnp.asarray(w3, jnp.float32)
    inp, hidden = w1.shape
    nlayers = wh.shape[0]
    out = w3.shape[1]

    inp_pad = _round_up(inp, 16)          # bf16 sublane-packing granularity
    dh = _round_up(hidden, LANE)
    dout = _round_up(out, LANE)

    # Per-matrix padding: each matmul only pays for its own dims.
    w1p = jnp.zeros((inp_pad, dh), jnp.float32).at[:inp, :hidden].set(w1)
    whp = jnp.zeros((nlayers, dh, dh), jnp.float32).at[:, :hidden, :hidden].set(wh)
    w3p = jnp.zeros((dh, dout), jnp.float32).at[:hidden, :out].set(w3)

    # f32 param slab: b1 | bh | gamma | beta (padded lanes stay 0).
    rows = _round_up(3 * nlayers + 1, SUBLANE)
    pb = jnp.zeros((rows, dh), jnp.float32)
    pb = pb.at[0, :hidden].set(jnp.asarray(b1, jnp.float32).reshape(-1))
    pb = pb.at[1:nlayers + 1, :hidden].set(jnp.asarray(bh, jnp.float32))
    pb = pb.at[nlayers + 1:2 * nlayers + 1, :hidden].set(
        jnp.asarray(gamma, jnp.float32))
    pb = pb.at[2 * nlayers + 1:3 * nlayers + 1, :hidden].set(
        jnp.asarray(beta, jnp.float32))

    # Output bias row: padded lanes = -1e30 so softmax sends them to exactly 0.
    b3p = jnp.full((1, dout), -1e30, jnp.float32)
    b3p = b3p.at[0, :out].set(jnp.asarray(b3, jnp.float32).reshape(-1))

    arrays = {
        "w1": w1p.astype(weight_dtype),
        "wh": whp.astype(weight_dtype),
        "w3": w3p.astype(weight_dtype),
        "pb": pb,
        "b3": b3p,
    }
    dims = {"inp": inp, "hidden": hidden, "out": out, "nlayers": nlayers}
    return arrays, dims


# --------------------------------------------------------------------------- #
# Forward
# --------------------------------------------------------------------------- #
def _default_block_b(batch):
    """Generation-aware batch tile.

    v7x has 2 TensorCores -> want >= 2 grid steps per core so double-buffering
    overlaps the x-in / o-out DMAs with compute.  Single-TC v5e/v6e -> one big
    tile (extra grid steps are pure serial overhead at this model size, and a
    big M better fills the MXU).
    """
    bp8 = _round_up(batch, SUBLANE)
    try:
        kind = jax.devices()[0].device_kind.lower()
    except Exception:
        kind = ""
    if "v7" in kind:
        tb = _round_up(pl.cdiv(bp8, 4), SUBLANE)   # 2 cores x >= 2 steps
        return max(SUBLANE, min(tb, 512))
    return max(SUBLANE, min(bp8, 1024))


@functools.partial(
    jax.jit, static_argnames=("inp", "hidden", "out", "nlayers", "block_b"))
def _dqn_memory_forward_impl(x, w1p, whp, w3p, pb, b3p, *,
                             inp, hidden, out, nlayers, block_b):
    B = x.shape[0]
    inp_pad, dh = w1p.shape
    dout = w3p.shape[1]
    rows = pb.shape[0]
    f32 = jnp.float32

    x = x.astype(f32)
    # Lane padding only if the true input width is not 16-aligned (no-op here).
    if x.shape[1] != inp_pad:
        x = jnp.concatenate(
            [x, jnp.zeros((B, inp_pad - x.shape[1]), f32)], axis=1)

    TB = min(block_b, _round_up(B, SUBLANE))
    Bp = _round_up(B, TB)
    if Bp != B:  # row padding only when B is not a multiple of the tile
        x = jnp.concatenate([x, jnp.zeros((Bp - B, inp_pad), f32)], axis=0)

    kernel = functools.partial(dqn_memory_kernel, hidden=hidden, nlayers=nlayers)

    out_pad = pl.pallas_call(
        kernel,
        out_shape=jax.ShapeDtypeStruct((Bp, dout), jnp.float32),
        grid=(Bp // TB,),
        in_specs=[
            pl.BlockSpec((TB, inp_pad), lambda i: (i, 0)),          # x tile
            pl.BlockSpec((inp_pad, dh), lambda i: (0, 0)),          # W1 (resident)
            pl.BlockSpec((nlayers, dh, dh), lambda i: (0, 0, 0)),   # Wh (resident)
            pl.BlockSpec((dh, dout), lambda i: (0, 0)),             # W3 (resident)
            pl.BlockSpec((rows, dh), lambda i: (0, 0)),             # b1|bh|g|b
            pl.BlockSpec((1, dout), lambda i: (0, 0)),              # b3
        ],
        out_specs=pl.BlockSpec((TB, dout), lambda i: (i, 0)),
        compiler_params=pltpu.CompilerParams(
            dimension_semantics=("parallel",)),
    )(x, w1p, whp, w3p, pb, b3p)

    return out_pad[:B, :out]


def dqn_memory_forward(x, arrays, dims, block_b=None):
    if block_b is None:
        block_b = _default_block_b(x.shape[0])
    return _dqn_memory_forward_impl(
        x, arrays["w1"], arrays["wh"], arrays["w3"], arrays["pb"], arrays["b3"],
        inp=dims["inp"], hidden=dims["hidden"], out=dims["out"],
        nlayers=dims["nlayers"], block_b=int(block_b))


# --------------------------------------------------------------------------- #
# Pure-JAX reference (eval-mode semantics of the PyTorch module)
# --------------------------------------------------------------------------- #
def reference_forward(x, w1, b1, wh, bh, gamma, beta, w3, b3):
    nlayers = wh.shape[0]
    o = jax.nn.relu(x @ w1 + b1)
    for i in range(nlayers):
        t = o @ wh[i] + bh[i]
        o = o + t
        mu = jnp.mean(o, axis=-1, keepdims=True)
        var = jnp.mean((o - mu) ** 2, axis=-1, keepdims=True)
        o = (o - mu) / jnp.sqrt(var + LN_EPS) * gamma[i] + beta[i]
    logits = o @ w3 + b3
    return jax.nn.softmax(logits, axis=-1)


if __name__ == "__main__":
    B, INP, HIDDEN, OUT, NL = 128, 16, 32, 8, 4

    key = jax.random.PRNGKey(0)
    ks = jax.random.split(key, 9)

    x = jax.random.normal(ks[0], (B, INP), dtype=jnp.float32)

    # Deterministic synthetic parameter init (PyTorch-like scale).
    w1 = jax.random.uniform(ks[1], (INP, HIDDEN), jnp.float32,
                            -1.0 / INP**0.5, 1.0 / INP**0.5)
    b1 = jax.random.uniform(ks[2], (1, HIDDEN), jnp.float32,
                            -1.0 / INP**0.5, 1.0 / INP**0.5)
    wh = jax.random.uniform(ks[3], (NL, HIDDEN, HIDDEN), jnp.float32,
                            -1.0 / HIDDEN**0.5, 1.0 / HIDDEN**0.5)
    bh = jax.random.uniform(ks[4], (NL, HIDDEN), jnp.float32,
                            -1.0 / HIDDEN**0.5, 1.0 / HIDDEN**0.5)
    gamma = 1.0 + 0.1 * jax.random.normal(ks[5], (NL, HIDDEN), jnp.float32)
    beta = 0.1 * jax.random.normal(ks[6], (NL, HIDDEN), jnp.float32)
    w3 = jax.random.uniform(ks[7], (HIDDEN, OUT), jnp.float32,
                            -1.0 / HIDDEN**0.5, 1.0 / HIDDEN**0.5)
    b3 = jax.random.uniform(ks[8], (1, OUT), jnp.float32,
                            -1.0 / HIDDEN**0.5, 1.0 / HIDDEN**0.5)

    # One-time packing (model init), then the hot-path forward.
    arrays, dims = prepare_params(w1, b1, wh, bh, gamma, beta, w3, b3)
    arrays = jax.block_until_ready(arrays)

    out = dqn_memory_forward(x, arrays, dims)
    out = jax.block_until_ready(out)

    ref = reference_forward(x, w1, b1, wh, bh, gamma, beta, w3, b3)
    assert out.shape == (B, OUT)
    # bf16 weights (f32 accumulation) vs f32 reference -> loosened tolerance.
    assert jnp.allclose(out, ref, atol=2e-2, rtol=2e-2), "mismatch vs reference"

    print("KERNEL_OK")
</pallas_src>

<mosaic_0001>
module attributes {stable_mosaic.version = 11 : i64} {
  func.func @dqn_memory_kernel(%arg0: i32, %arg1: memref<128x16xf32, #tpu.memory_space<vmem>>, %arg2: memref<16x128xbf16, #tpu.memory_space<vmem>>, %arg3: memref<4x128x128xbf16, #tpu.memory_space<vmem>>, %arg4: memref<128x128xbf16, #tpu.memory_space<vmem>>, %arg5: memref<16x128xf32, #tpu.memory_space<vmem>>, %arg6: memref<1x128xf32, #tpu.memory_space<vmem>>, %arg7: memref<128x128xf32, #tpu.memory_space<vmem>>) attributes {dimension_semantics = [#tpu.dimension_semantics<parallel>], iteration_bounds = array<i64: 1>, scalar_prefetch = 0 : i64, scratch_operands = 0 : i64, tpu.core_type = #tpu.core_type<tc>, window_params = [{transform_indices = @transform_0, window_bounds = array<i64: 128, 16>}, {pipeline_mode = #tpu.pipeline_mode<synchronous>, transform_indices = @transform_1, window_bounds = array<i64: 16, 128>}, {pipeline_mode = #tpu.pipeline_mode<synchronous>, transform_indices = @transform_2, window_bounds = array<i64: 4, 128, 128>}, {pipeline_mode = #tpu.pipeline_mode<synchronous>, transform_indices = @transform_3, window_bounds = array<i64: 128, 128>}, {pipeline_mode = #tpu.pipeline_mode<synchronous>, transform_indices = @transform_4, window_bounds = array<i64: 16, 128>}, {pipeline_mode = #tpu.pipeline_mode<synchronous>, transform_indices = @transform_5, window_bounds = array<i64: 1, 128>}, {transform_indices = @transform_6, window_bounds = array<i64: 128, 128>}]} {
    %c0 = arith.constant 0 : index
    %c0_0 = arith.constant 0 : index
    %0 = vector.load %arg1[%c0, %c0_0] : memref<128x16xf32, #tpu.memory_space<vmem>>, vector<128x16xf32>
    %1 = arith.truncf %0 : vector<128x16xf32> to vector<128x16xbf16>
    %c0_1 = arith.constant 0 : index
    %c0_2 = arith.constant 0 : index
    %2 = vector.load %arg2[%c0_1, %c0_2] : memref<16x128xbf16, #tpu.memory_space<vmem>>, vector<16x128xbf16>
    %cst = arith.constant dense<0.000000e+00> : vector<128x128xf32>
    %3 = tpu.matmul %1, %2, %cst {dimension_numbers = #tpu.dot_dimension_numbers<[1], [0], [0], [1], [0, 0, 1, 1], [], []>} : vector<128x16xbf16>, vector<16x128xbf16>, vector<128x128xf32> -> vector<128x128xf32>
    %c0_3 = arith.constant 0 : index
    %c0_4 = arith.constant 0 : index
    %4 = vector.load %arg5[%c0_3, %c0_4] : memref<16x128xf32, #tpu.memory_space<vmem>>, vector<1x128xf32>
    %5 = vector.broadcast %4 : vector<1x128xf32> to vector<128x128xf32>
    %6 = arith.addf %3, %5 : vector<128x128xf32>
    %cst_5 = arith.constant 0.000000e+00 : f32
    %7 = vector.broadcast %cst_5 : f32 to vector<128x128xf32>
    %8 = arith.maximumf %6, %7 : vector<128x128xf32>
    %9 = arith.truncf %8 : vector<128x128xf32> to vector<128x128xbf16>
    %c0_6 = arith.constant 0 : index
    %c0_7 = arith.constant 0 : index
    %c0_8 = arith.constant 0 : index
    %10 = vector.load %arg3[%c0_6, %c0_7, %c0_8] : memref<4x128x128xbf16, #tpu.memory_space<vmem>>, vector<1x128x128xbf16>
    %11 = vector.shape_cast %10 : vector<1x128x128xbf16> to vector<128x128xbf16>
    %cst_9 = arith.constant dense<0.000000e+00> : vector<128x128xf32>
    %12 = tpu.matmul %9, %11, %cst_9 {dimension_numbers = #tpu.dot_dimension_numbers<[1], [0], [0], [1], [0, 0, 1, 1], [], []>} : vector<128x128xbf16>, vector<128x128xbf16>, vector<128x128xf32> -> vector<128x128xf32>
    %13 = arith.addf %8, %12 : vector<128x128xf32>
    %c1 = arith.constant 1 : index
    %c0_10 = arith.constant 0 : index
    %14 = vector.load %arg5[%c1, %c0_10] : memref<16x128xf32, #tpu.memory_space<vmem>>, vector<1x128xf32>
    %15 = vector.broadcast %14 : vector<1x128xf32> to vector<128x128xf32>
    %16 = arith.addf %13, %15 : vector<128x128xf32>
    %cst_11 = arith.constant dense<0.000000e+00> : vector<128xf32>
    %17 = vector.multi_reduction <add>, %16, %cst_11 [1] : vector<128x128xf32> to vector<128xf32>
    %18 = vector.shape_cast %17 : vector<128xf32> to vector<128x1xf32>
    %19 = arith.mulf %16, %16 : vector<128x128xf32>
    %cst_12 = arith.constant dense<0.000000e+00> : vector<128xf32>
    %20 = vector.multi_reduction <add>, %19, %cst_12 [1] : vector<128x128xf32> to vector<128xf32>
    %21 = vector.shape_cast %20 : vector<128xf32> to vector<128x1xf32>
    %cst_13 = arith.constant 3.125000e-02 : f32
    %22 = vector.broadcast %cst_13 : f32 to vector<128x1xf32>
    %23 = arith.mulf %18, %22 : vector<128x1xf32>
    %cst_14 = arith.constant 3.125000e-02 : f32
    %24 = vector.broadcast %cst_14 : f32 to vector<128x1xf32>
    %25 = arith.mulf %21, %24 : vector<128x1xf32>
    %26 = arith.mulf %23, %23 : vector<128x1xf32>
    %27 = arith.subf %25, %26 : vector<128x1xf32>
    %cst_15 = arith.constant 0.000000e+00 : f32
    %28 = vector.broadcast %cst_15 : f32 to vector<128x1xf32>
    %29 = arith.maximumf %27, %28 : vector<128x1xf32>
    %30 = vector.broadcast %23 : vector<128x1xf32> to vector<128x128xf32>
    %31 = arith.subf %16, %30 : vector<128x128xf32>
    %cst_16 = arith.constant 9.99999974E-6 : f32
    %32 = vector.broadcast %cst_16 : f32 to vector<128x1xf32>
    %33 = arith.addf %29, %32 : vector<128x1xf32>
    %34 = math.rsqrt %33 : vector<128x1xf32>
    %35 = vector.broadcast %34 : vector<128x1xf32> to vector<128x128xf32>
    %36 = arith.mulf %31, %35 : vector<128x128xf32>
    %c5 = arith.constant 5 : index
    %c0_17 = arith.constant 0 : index
    %37 = vector.load %arg5[%c5, %c0_17] : memref<16x128xf32, #tpu.memory_space<vmem>>, vector<1x128xf32>
    %c9 = arith.constant 9 : index
    %c0_18 = arith.constant 0 : index
    %38 = vector.load %arg5[%c9, %c0_18] : memref<16x128xf32, #tpu.memory_space<vmem>>, vector<1x128xf32>
    %39 = vector.broadcast %37 : vector<1x128xf32> to vector<128x128xf32>
    %40 = arith.mulf %36, %39 : vector<128x128xf32>
    %41 = vector.broadcast %38 : vector<1x128xf32> to vector<128x128xf32>
    %42 = arith.addf %40, %41 : vector<128x128xf32>
    %43 = arith.truncf %42 : vector<128x128xf32> to vector<128x128xbf16>
    %c1_19 = arith.constant 1 : index
    %c0_20 = arith.constant 0 : index
    %c0_21 = arith.constant 0 : index
    %44 = vector.load %arg3[%c1_19, %c0_20, %c0_21] : memref<4x128x128xbf16, #tpu.memory_space<vmem>>, vector<1x128x128xbf16>
    %45 = vector.shape_cast %44 : vector<1x128x128xbf16> to vector<128x128xbf16>
    %cst_22 = arith.constant dense<0.000000e+00> : vector<128x128xf32>
    %46 = tpu.matmul %43, %45, %cst_22 {dimension_numbers = #tpu.dot_dimension_numbers<[1], [0], [0], [1], [0, 0, 1, 1], [], []>} : vector<128x128xbf16>, vector<128x128xbf16>, vector<128x128xf32> -> vector<128x128xf32>
    %47 = arith.addf %42, %46 : vector<128x128xf32>
    %c2 = arith.constant 2 : index
    %c0_23 = arith.constant 0 : index
    %48 = vector.load %arg5[%c2, %c0_23] : memref<16x128xf32, #tpu.memory_space<vmem>>, vector<1x128xf32>
    %49 = vector.broadcast %48 : vector<1x128xf32> to vector<128x128xf32>
    %50 = arith.addf %47, %49 : vector<128x128xf32>
    %cst_24 = arith.constant dense<0.000000e+00> : vector<128xf32>
    %51 = vector.multi_reduction <add>, %50, %cst_24 [1] : vector<128x128xf32> to vector<128xf32>
    %52 = vector.shape_cast %51 : vector<128xf32> to vector<128x1xf32>
    %53 = arith.mulf %50, %50 : vector<128x128xf32>
    %cst_25 = arith.constant dense<0.000000e+00> : vector<128xf32>
    %54 = vector.multi_reduction <add>, %53, %cst_25 [1] : vector<128x128xf32> to vector<128xf32>
    %55 = vector.shape_cast %54 : vector<128xf32> to vector<128x1xf32>
    %cst_26 = arith.constant 3.125000e-02 : f32
    %56 = vector.broadcast %cst_26 : f32 to vector<128x1xf32>
    %57 = arith.mulf %52, %56 : vector<128x1xf32>
    %cst_27 = arith.constant 3.125000e-02 : f32
    %58 = vector.broadcast %cst_27 : f32 to vector<128x1xf32>
    %59 = arith.mulf %55, %58 : vector<128x1xf32>
    %60 = arith.mulf %57, %57 : vector<128x1xf32>
    %61 = arith.subf %59, %60 : vector<128x1xf32>
    %cst_28 = arith.constant 0.000000e+00 : f32
    %62 = vector.broadcast %cst_28 : f32 to vector<128x1xf32>
    %63 = arith.maximumf %61, %62 : vector<128x1xf32>
    %64 = vector.broadcast %57 : vector<128x1xf32> to vector<128x128xf32>
    %65 = arith.subf %50, %64 : vector<128x128xf32>
    %cst_29 = arith.constant 9.99999974E-6 : f32
    %66 = vector.broadcast %cst_29 : f32 to vector<128x1xf32>
    %67 = arith.addf %63, %66 : vector<128x1xf32>
    %68 = math.rsqrt %67 : vector<128x1xf32>
    %69 = vector.broadcast %68 : vector<128x1xf32> to vector<128x128xf32>
    %70 = arith.mulf %65, %69 : vector<128x128xf32>
    %c6 = arith.constant 6 : index
    %c0_30 = arith.constant 0 : index
    %71 = vector.load %arg5[%c6, %c0_30] : memref<16x128xf32, #tpu.memory_space<vmem>>, vector<1x128xf32>
    %c10 = arith.constant 10 : index
    %c0_31 = arith.constant 0 : index
    %72 = vector.load %arg5[%c10, %c0_31] : memref<16x128xf32, #tpu.memory_space<vmem>>, vector<1x128xf32>
    %73 = vector.broadcast %71 : vector<1x128xf32> to vector<128x128xf32>
    %74 = arith.mulf %70, %73 : vector<128x128xf32>
    %75 = vector.broadcast %72 : vector<1x128xf32> to vector<128x128xf32>
    %76 = arith.addf %74, %75 : vector<128x128xf32>
    %77 = arith.truncf %76 : vector<128x128xf32> to vector<128x128xbf16>
    %c2_32 = arith.constant 2 : index
    %c0_33 = arith.constant 0 : index
    %c0_34 = arith.constant 0 : index
    %78 = vector.load %arg3[%c2_32, %c0_33, %c0_34] : memref<4x128x128xbf16, #tpu.memory_space<vmem>>, vector<1x128x128xbf16>
    %79 = vector.shape_cast %78 : vector<1x128x128xbf16> to vector<128x128xbf16>
    %cst_35 = arith.constant dense<0.000000e+00> : vector<128x128xf32>
    %80 = tpu.matmul %77, %79, %cst_35 {dimension_numbers = #tpu.dot_dimension_numbers<[1], [0], [0], [1], [0, 0, 1, 1], [], []>} : vector<128x128xbf16>, vector<128x128xbf16>, vector<128x128xf32> -> vector<128x128xf32>
    %81 = arith.addf %76, %80 : vector<128x128xf32>
    %c3 = arith.constant 3 : index
    %c0_36 = arith.constant 0 : index
    %82 = vector.load %arg5[%c3, %c0_36] : memref<16x128xf32, #tpu.memory_space<vmem>>, vector<1x128xf32>
    %83 = vector.broadcast %82 : vector<1x128xf32> to vector<128x128xf32>
    %84 = arith.addf %81, %83 : vector<128x128xf32>
    %cst_37 = arith.constant dense<0.000000e+00> : vector<128xf32>
    %85 = vector.multi_reduction <add>, %84, %cst_37 [1] : vector<128x128xf32> to vector<128xf32>
    %86 = vector.shape_cast %85 : vector<128xf32> to vector<128x1xf32>
    %87 = arith.mulf %84, %84 : vector<128x128xf32>
    %cst_38 = arith.constant dense<0.000000e+00> : vector<128xf32>
    %88 = vector.multi_reduction <add>, %87, %cst_38 [1] : vector<128x128xf32> to vector<128xf32>
    %89 = vector.shape_cast %88 : vector<128xf32> to vector<128x1xf32>
    %cst_39 = arith.constant 3.125000e-02 : f32
    %90 = vector.broadcast %cst_39 : f32 to vector<128x1xf32>
    %91 = arith.mulf %86, %90 : vector<128x1xf32>
    %cst_40 = arith.constant 3.125000e-02 : f32
    %92 = vector.broadcast %cst_40 : f32 to vector<128x1xf32>
    %93 = arith.mulf %89, %92 : vector<128x1xf32>
    %94 = arith.mulf %91, %91 : vector<128x1xf32>
    %95 = arith.subf %93, %94 : vector<128x1xf32>
    %cst_41 = arith.constant 0.000000e+00 : f32
    %96 = vector.broadcast %cst_41 : f32 to vector<128x1xf32>
    %97 = arith.maximumf %95, %96 : vector<128x1xf32>
    %98 = vector.broadcast %91 : vector<128x1xf32> to vector<128x128xf32>
    %99 = arith.subf %84, %98 : vector<128x128xf32>
    %cst_42 = arith.constant 9.99999974E-6 : f32
    %100 = vector.broadcast %cst_42 : f32 to vector<128x1xf32>
    %101 = arith.addf %97, %100 : vector<128x1xf32>
    %102 = math.rsqrt %101 : vector<128x1xf32>
    %103 = vector.broadcast %102 : vector<128x1xf32> to vector<128x128xf32>
    %104 = arith.mulf %99, %103 : vector<128x128xf32>
    %c7 = arith.constant 7 : index
    %c0_43 = arith.constant 0 : index
    %105 = vector.load %arg5[%c7, %c0_43] : memref<16x128xf32, #tpu.memory_space<vmem>>, vector<1x128xf32>
    %c11 = arith.constant 11 : index
    %c0_44 = arith.constant 0 : index
    %106 = vector.load %arg5[%c11, %c0_44] : memref<16x128xf32, #tpu.memory_space<vmem>>, vector<1x128xf32>
    %107 = vector.broadcast %105 : vector<1x128xf32> to vector<128x128xf32>
    %108 = arith.mulf %104, %107 : vector<128x128xf32>
    %109 = vector.broadcast %106 : vector<1x128xf32> to vector<128x128xf32>
    %110 = arith.addf %108, %109 : vector<128x128xf32>
    %111 = arith.truncf %110 : vector<128x128xf32> to vector<128x128xbf16>
    %c3_45 = arith.constant 3 : index
    %c0_46 = arith.constant 0 : index
    %c0_47 = arith.constant 0 : index
    %112 = vector.load %arg3[%c3_45, %c0_46, %c0_47] : memref<4x128x128xbf16, #tpu.memory_space<vmem>>, vector<1x128x128xbf16>
    %113 = vector.shape_cast %112 : vector<1x128x128xbf16> to vector<128x128xbf16>
    %cst_48 = arith.constant dense<0.000000e+00> : vector<128x128xf32>
    %114 = tpu.matmul %111, %113, %cst_48 {dimension_numbers = #tpu.dot_dimension_numbers<[1], [0], [0], [1], [0, 0, 1, 1], [], []>} : vector<128x128xbf16>, vector<128x128xbf16>, vector<128x128xf32> -> vector<128x128xf32>
    %115 = arith.addf %110, %114 : vector<128x128xf32>
    %c4 = arith.constant 4 : index
    %c0_49 = arith.constant 0 : index
    %116 = vector.load %arg5[%c4, %c0_49] : memref<16x128xf32, #tpu.memory_space<vmem>>, vector<1x128xf32>
    %117 = vector.broadcast %116 : vector<1x128xf32> to vector<128x128xf32>
    %118 = arith.addf %115, %117 : vector<128x128xf32>
    %cst_50 = arith.constant dense<0.000000e+00> : vector<128xf32>
    %119 = vector.multi_reduction <add>, %118, %cst_50 [1] : vector<128x128xf32> to vector<128xf32>
    %120 = vector.shape_cast %119 : vector<128xf32> to vector<128x1xf32>
    %121 = arith.mulf %118, %118 : vector<128x128xf32>
    %cst_51 = arith.constant dense<0.000000e+00> : vector<128xf32>
    %122 = vector.multi_reduction <add>, %121, %cst_51 [1] : vector<128x128xf32> to vector<128xf32>
    %123 = vector.shape_cast %122 : vector<128xf32> to vector<128x1xf32>
    %cst_52 = arith.constant 3.125000e-02 : f32
    %124 = vector.broadcast %cst_52 : f32 to vector<128x1xf32>
    %125 = arith.mulf %120, %124 : vector<128x1xf32>
    %cst_53 = arith.constant 3.125000e-02 : f32
    %126 = vector.broadcast %cst_53 : f32 to vector<128x1xf32>
    %127 = arith.mulf %123, %126 : vector<128x1xf32>
    %128 = arith.mulf %125, %125 : vector<128x1xf32>
    %129 = arith.subf %127, %128 : vector<128x1xf32>
    %cst_54 = arith.constant 0.000000e+00 : f32
    %130 = vector.broadcast %cst_54 : f32 to vector<128x1xf32>
    %131 = arith.maximumf %129, %130 : vector<128x1xf32>
    %132 = vector.broadcast %125 : vector<128x1xf32> to vector<128x128xf32>
    %133 = arith.subf %118, %132 : vector<128x128xf32>
    %cst_55 = arith.constant 9.99999974E-6 : f32
    %134 = vector.broadcast %cst_55 : f32 to vector<128x1xf32>
    %135 = arith.addf %131, %134 : vector<128x1xf32>
    %136 = math.rsqrt %135 : vector<128x1xf32>
    %137 = vector.broadcast %136 : vector<128x1xf32> to vector<128x128xf32>
    %138 = arith.mulf %133, %137 : vector<128x128xf32>
    %c8 = arith.constant 8 : index
    %c0_56 = arith.constant 0 : index
    %139 = vector.load %arg5[%c8, %c0_56] : memref<16x128xf32, #tpu.memory_space<vmem>>, vector<1x128xf32>
    %c12 = arith.constant 12 : index
    %c0_57 = arith.constant 0 : index
    %140 = vector.load %arg5[%c12, %c0_57] : memref<16x128xf32, #tpu.memory_space<vmem>>, vector<1x128xf32>
    %141 = vector.broadcast %139 : vector<1x128xf32> to vector<128x128xf32>
    %142 = arith.mulf %138, %141 : vector<128x128xf32>
    %143 = vector.broadcast %140 : vector<1x128xf32> to vector<128x128xf32>
    %144 = arith.addf %142, %143 : vector<128x128xf32>
    %145 = arith.truncf %144 : vector<128x128xf32> to vector<128x128xbf16>
    %c0_58 = arith.constant 0 : index
    %c0_59 = arith.constant 0 : index
    %146 = vector.load %arg4[%c0_58, %c0_59] : memref<128x128xbf16, #tpu.memory_space<vmem>>, vector<128x128xbf16>
    %cst_60 = arith.constant dense<0.000000e+00> : vector<128x128xf32>
    %147 = tpu.matmul %145, %146, %cst_60 {dimension_numbers = #tpu.dot_dimension_numbers<[1], [0], [0], [1], [0, 0, 1, 1], [], []>} : vector<128x128xbf16>, vector<128x128xbf16>, vector<128x128xf32> -> vector<128x128xf32>
    %c0_61 = arith.constant 0 : index
    %c0_62 = arith.constant 0 : index
    %148 = vector.load %arg6[%c0_61, %c0_62] : memref<1x128xf32, #tpu.memory_space<vmem>>, vector<1x128xf32>
    %149 = vector.broadcast %148 : vector<1x128xf32> to vector<128x128xf32>
    %150 = arith.addf %147, %149 : vector<128x128xf32>
    %cst_63 = arith.constant dense<0xFF800000> : vector<128xf32>
    %151 = vector.multi_reduction <maximumf>, %150, %cst_63 [1] : vector<128x128xf32> to vector<128xf32>
    %152 = vector.shape_cast %151 : vector<128xf32> to vector<128x1xf32>
    %153 = vector.broadcast %152 : vector<128x1xf32> to vector<128x128xf32>
    %154 = arith.subf %150, %153 : vector<128x128xf32>
    %155 = math.exp %154 : vector<128x128xf32>
    %cst_64 = arith.constant dense<0.000000e+00> : vector<128xf32>
    %156 = vector.multi_reduction <add>, %155, %cst_64 [1] : vector<128x128xf32> to vector<128xf32>
    %157 = vector.shape_cast %156 : vector<128xf32> to vector<128x1xf32>
    %158 = tpu.reciprocal %157 {approx = true} : vector<128x1xf32> -> vector<128x1xf32>
    %159 = vector.broadcast %158 : vector<128x1xf32> to vector<128x128xf32>
    %160 = arith.mulf %155, %159 : vector<128x128xf32>
    %c0_65 = arith.constant 0 : index
    %c0_66 = arith.constant 0 : index
    %161 = vector.load %arg7[%c0_65, %c0_66] : memref<128x128xf32, #tpu.memory_space<vmem>>, vector<128x128xf32>
    tpu.vector_store %arg7[%c0_65, %c0_66], %160 {strides = array<i32>} : memref<128x128xf32, #tpu.memory_space<vmem>>, vector<128x128xf32>,
    return
  }
  func.func @transform_0(%arg0: i32) -> (i32, i32) {
    %c0_i32 = arith.constant 0 : i32
    %c0_i32_0 = arith.constant 0 : i32
    return %arg0, %c0_i32 : i32, i32
  }
  func.func @transform_1(%arg0: i32) -> (i32, i32) {
    %c0_i32 = arith.constant 0 : i32
    %c0_i32_0 = arith.constant 0 : i32
    %c0_i32_1 = arith.constant 0 : i32
    return %c0_i32, %c0_i32_0 : i32, i32
  }
  func.func @transform_2(%arg0: i32) -> (i32, i32, i32) {
    %c0_i32 = arith.constant 0 : i32
    %c0_i32_0 = arith.constant 0 : i32
    %c0_i32_1 = arith.constant 0 : i32
    %c0_i32_2 = arith.constant 0 : i32
    return %c0_i32, %c0_i32_0, %c0_i32_1 : i32, i32, i32
  }
  func.func @transform_3(%arg0: i32) -> (i32, i32) {
    %c0_i32 = arith.constant 0 : i32
    %c0_i32_0 = arith.constant 0 : i32
    %c0_i32_1 = arith.constant 0 : i32
    return %c0_i32, %c0_i32_0 : i32, i32
  }
  func.func @transform_4(%arg0: i32) -> (i32, i32) {
    %c0_i32 = arith.constant 0 : i32
    %c0_i32_0 = arith.constant 0 : i32
    %c0_i32_1 = arith.constant 0 : i32
    return %c0_i32, %c0_i32_0 : i32, i32
  }
  func.func @transform_5(%arg0: i32) -> (i32, i32) {
    %c0_i32 = arith.constant 0 : i32
    %c0_i32_0 = arith.constant 0 : i32
    %c0_i32_1 = arith.constant 0 : i32
    return %c0_i32, %c0_i32_0 : i32, i32
  }
  func.func @transform_6(%arg0: i32) -> (i32, i32) {
    %c0_i32 = arith.constant 0 : i32
    %c0_i32_0 = arith.constant 0 : i32
    return %arg0, %c0_i32 : i32, i32
  }
}

</mosaic_0001>

<bundles_post_ra>
// kernel: _dqn_memory_forward_impl.1
= control target key start
LH: loop header
LB: loop body
LE: loop exit
PB: predicated region body
PF: predicated region fallthrough
CT: control target
= control target key end

     0   :  { %11 = vsyncpa [#allocation3], 0  ;;  %s3051_s21 = smov [#allocation2]   ;;  %s4549_s0 = inlined_call_operand.vmem [shape: f32[128,16], index: 0, kind: input, shape index: {}]   ;;  %s4550_s1 = inlined_call_operand.vmem [shape: bf16[16,128], index: 1, kind: input, shape index: {}]   ;;  %s4551_s2 = inlined_call_operand.hbm [shape: bf16[4,128,128], index: 2, kind: input, shape index: {}]   ;;  %s4552_s3 = inlined_call_operand.vmem [shape: bf16[128,128], index: 3, kind: input, shape index: {}]   ;;  %s4553_s4 = inlined_call_operand.vmem [shape: f32[16,128], index: 4, kind: input, shape index: {}]   ;;  %s4554_s5 = inlined_call_operand.vmem [shape: f32[1,128], index: 5, kind: input, shape index: {}]   ;;  %s4555_s6 = inlined_call_operand.vmem [shape: f32[128,128], index: 6, kind: output, shape index: {}]  }
   0x1   :  { %s21_s22 = sshll.u32 %s3051_s21, 4  ;;  %s3027_s25 = scalar_lea.hbm %s4551_s2, 4096  ;;  %s22_s22 = int_to_ptr.vmem [resolvable:$true] %s21_s22 }
   0x2   :  { %p3028_p0 = scmp.ne.s32.totalorder %s4551_s2, %s3027_s25  ;;  %p3031_p1 = scmp.lt.u32.totalorder %s3027_s25, %s4551_s2 }
   0x4   :  { %p3033_p2 = pnand %p3031_p1, %p3028_p0 }
   0x6   :  { %3036 = shalt.err (!%p3033_p2)
}
   0x7   :  { %s3037_s30 = scalar_lea.vmem %s22_s22, 4096  ;;  %p3042_p4 = scmp.lt.s32.totalorder %s22_s22, %s22_s22 }
   0x8   :  { %p3038_p3 = scmp.ne.s32.totalorder %s22_s22, %s3037_s30  ;;  %p3043_p5 = scmp.lt.s32.totalorder %s3037_s30, %s3037_s30 }
   0xa   :  { %p3044_p6 = por %p3043_p5, %p3042_p4 }
   0xc   :  { %p3045_p7 = pnand %p3044_p6, %p3038_p3 }
   0xe   :  { %3048 = shalt.err (!%p3045_p7)
}
   0xf   :  { %s3052_s7 = smov 64   ;;  %s3053_s8 = smov 4  }
  0x10   :  { %27 = dma.hbm_to_vmem [thread:$0]  %s4551_s2, 4096, %s22_s22, [#allocation3], %s3052_s7, %s3052_s7, %s3053_s8  }
  0x11   :  { %3049 = dma.done.wait [#allocation3], 4096  }
  0x12   :  { %3050 = vsyncadd [#allocation3], 4294963200  ;;  %v2794_v0 = vld [vmem:[%s4550_s1] sm:$0xff]   ;;  %v39_v2 = vld [vmem:[%s4549_s0 + $0x8] sm:$0xff]  ;;  %vm75_vm0 = vcmask 130048  }
  0x13   :  { %v38_v1 = vld [vmem:[%s4549_s0] sm:$0xff]  ;;  %v40_v3 = vld [vmem:[%s4549_s0 + $0x10] sm:$0xff]  ;;  %2597 = vmatprep.subr.bf16.mxu0 %v2794_v0  ;;  %v41_v5 = vld [vmem:[%s4549_s0 + $0x18] sm:$0xff] }
  0x14   :  { %v54_v4 = vpack.c.bf16 %v39_v2, %v38_v1  ;;  %v42_v6 = vld [vmem:[%s4549_s0 + $0x20] sm:$0xff]  ;;  %v43_v7 = vld [vmem:[%s4549_s0 + $0x28] sm:$0xff]  ;;  %2598 = vmatpush3.bf16.msra.mxu0 %v2794_v0  ;;  %v55_v8 = vpack.c.bf16 %v41_v5, %v40_v3  ;;  %v44_v10 = vld [vmem:[%s4549_s0 + $0x30] sm:$0xff] }
  0x15   :  { %v56_v9 = vpack.c.bf16 %v43_v7, %v42_v6  ;;  %v45_v11 = vld [vmem:[%s4549_s0 + $0x38] sm:$0xff]  ;;  %v46_v12 = vld [vmem:[%s4549_s0 + $0x40] sm:$0xff]  ;;  %v47_v13 = vld [vmem:[%s4549_s0 + $0x48] sm:$0xff] }
  0x16   :  { %2599 = vmatprep.mubr.msk.bf16.mxu0 %vm75_vm0, %v54_v4  ;;  %v2795_v14 = vld [vmem:[#allocation2] sm:$0xff]   ;;  %v2796_v15 = vld [vmem:[#allocation2 + $0x8] sm:$0xff]   ;;  %v57_v16 = vpack.c.bf16 %v45_v11, %v44_v10  ;;  %v58_v17 = vpack.c.bf16 %v47_v13, %v46_v12  ;;  %v2797_v18 = vld [vmem:[#allocation2 + $0x10] sm:$0xff]  }
  0x17   :  { %2600 = vmatmul.mubr.msk.bf16.vlgmr.msra.gmra.mrb[0].mxu0 %vm75_vm0, %v55_v8  ;;  %2615 = vmatprep.subr.bf16.mxu1 %v2795_v14  ;;  %v48_v19 = vld [vmem:[%s4549_s0 + $0x50] sm:$0xff]  ;;  %v49_v20 = vld [vmem:[%s4549_s0 + $0x58] sm:$0xff]  ;;  %v50_v22 = vld [vmem:[%s4549_s0 + $0x60] sm:$0xff] }
  0x18   :  { %2603 = vmatprep.mubr.msk.bf16.mxu0 %vm75_vm0, %v56_v9  ;;  %2616 = vmatpush3.bf16.msra.mxu1 %v2795_v14  ;;  %v2798_v21 = vld [vmem:[#allocation2 + $0x18] sm:$0xff]   ;;  %v51_v23 = vld [vmem:[%s4549_s0 + $0x68] sm:$0xff]  ;;  %v2799_v24 = vld [vmem:[#allocation2 + $0x20] sm:$0xff]   ;;  %v59_v25 = vpack.c.bf16 %v49_v20, %v48_v19 }
  0x19   :  { %2617 = vmatprep.subr.bf16.mxu1 %v2796_v15  ;;  %v60_v26 = vpack.c.bf16 %v51_v23, %v50_v22  ;;  %v52_v27 = vld [vmem:[%s4549_s0 + $0x70] sm:$0xff]  ;;  %v53_v28 = vld [vmem:[%s4549_s0 + $0x78] sm:$0xff]  ;;  %v2800_v29 = vld [vmem:[#allocation2 + $0x28] sm:$0xff]  }
  0x1a   :  { %v61_v30 = vpack.c.bf16 %v53_v28, %v52_v27  ;;  %v2801_v31 = vld [vmem:[#allocation2 + $0x30] sm:$0xff]   ;;  %v2802_v32 = vld [vmem:[#allocation2 + $0x38] sm:$0xff]   ;;  %v2445_v33 = vld [vmem:[%s4553_s4] ss:$0 sm:$0xff] }
  0x1b   :  { %v3242_v27 = vld [vmem:[%s4553_s4 + $0x1] ss:$0 sm:$0xff] }
  0x1c   :  { %2618 = vmatpush3.bf16.msra.mxu1 %v2796_v15 }
  0x1d   :  { %2619 = vmatprep.subr.bf16.mxu1 %v2797_v18 }
  0x1f   :  { %2604 = vmatmul.mubr.msk.bf16.gmra.mrb[4].mxu0 %vm75_vm0, %v57_v16 }
  0x20   :  { %2607 = vmatprep.mubr.msk.bf16.mxu0 %vm75_vm0, %v58_v17  ;;  %2620 = vmatpush3.bf16.msra.mxu1 %v2797_v18 }
  0x21   :  { %2621 = vmatprep.subr.bf16.mxu1 %v2798_v21 }
  0x24   :  { %2622 = vmatpush3.bf16.msra.mxu1 %v2798_v21 }
  0x25   :  { %2623 = vmatprep.subr.bf16.mxu1 %v2799_v24 }
  0x27   :  { %2608 = vmatmul.mubr.msk.bf16.gmra.mrb[8].mxu0 %vm75_vm0, %v59_v25 }
  0x28   :  { %2611 = vmatprep.mubr.msk.bf16.mxu0 %vm75_vm0, %v60_v26  ;;  %2624 = vmatpush3.bf16.msra.mxu1 %v2799_v24 }
  0x29   :  { %2625 = vmatprep.subr.bf16.mxu1 %v2800_v29 }
  0x2c   :  { %2626 = vmatpush3.bf16.msra.mxu1 %v2800_v29 }
  0x2d   :  { %2627 = vmatprep.subr.bf16.mxu1 %v2801_v31 }
  0x2f   :  { %2612 = vmatmul.mubr.msk.bf16.gmra.mrb[12].mxu0 %vm75_vm0, %v61_v30 }
  0x30   :  { %2628 = vmatpush3.bf16.msra.mxu1 %v2801_v31 }
  0x31   :  { %2629 = vmatprep.subr.bf16.mxu1 %v2802_v32 }
  0x34   :  { %2630 = vmatpush3.bf16.msra.mxu1 %v2802_v32 }
  0xea   :  { %v2601_v34 = vpop.f32.mrb[0].mxu0 }
  0xeb   :  { %v134_v35 = vpop.f32.mrb[1].mxu0  ;;  %v3165_v38 = vadd.f32 %v2601_v34, %v2445_v33 }
  0xec   :  { %v3163_v36 = vadd.f32 %v2445_v33, %v134_v35  ;;  %v2602_v37 = vpop.f32.mrb[2].mxu0 }
  0xed   :  { %v3167_v39 = vadd.f32 %v2602_v37, %v2445_v33  ;;  %v137_v40 = vpop.f32.mrb[3].mxu0  ;;  %v199_v45 = vmax.f32 %v3165_v38, 0.0 }
  0xee   :  { %v3169_v41 = vadd.f32 %v2445_v33, %v137_v40  ;;  %v197_v43 = vmax.f32 %v3163_v36, 0.0 }
  0xef   :  { %v200_v42 = vmax.f32 %v3167_v39, 0.0 }
  0xf0   :  { %v198_v44 = vmax.f32 %v3169_v41, 0.0 }
  0xf1   :  { %v214_v48 = vpack.c.bf16 %v200_v42, %v199_v45 }
  0xf2   :  { %v2605_v46 = vpop.f32.mrb[4].mxu0  ;;  %v213_v47 = vpack.c.bf16 %v198_v44, %v197_v43 }
  0xf3   :  { %v3179_v49 = vadd.f32 %v2605_v46, %v2445_v33  ;;  %v150_v50 = vpop.f32.mrb[5].mxu0 }
  0xf4   :  { %v3181_v51 = vadd.f32 %v2445_v33, %v150_v50  ;;  %v2606_v52 = vpop.f32.mrb[6].mxu0  ;;  %2631 = vmatprep.mubr.bf16.mxu1 %v213_v47 }
  0xf5   :  { %v203_v53 = vmax.f32 %v3179_v49, 0.0  ;;  %v3184_v54 = vadd.f32 %v2606_v52, %v2445_v33  ;;  %v153_v55 = vpop.f32.mrb[7].mxu0  ;;  %2632 = vmatmul.mubr.bf16.vlgmr.msra.gmra.mrb[0].mxu1 %v214_v48 }
  0xf6   :  { %v201_v56 = vmax.f32 %v3181_v51, 0.0  ;;  %v3187_v57 = vadd.f32 %v2445_v33, %v153_v55 }
  0xf7   :  { %v204_v58 = vmax.f32 %v3184_v54, 0.0 }
  0xf8   :  { %v202_v59 = vmax.f32 %v3187_v57, 0.0 }
  0xf9   :  { %v216_v60 = vpack.c.bf16 %v204_v58, %v203_v53 }
  0xfa   :  { %v215_v61 = vpack.c.bf16 %v202_v59, %v201_v56  ;;  %v2609_v62 = vpop.f32.mrb[8].mxu0 }
  0xfb   :  { %v3199_v63 = vadd.f32 %v2609_v62, %v2445_v33  ;;  %v166_v0 = vpop.f32.mrb[9].mxu0 }
  0xfc   :  { %v3201_v1 = vadd.f32 %v2445_v33, %v166_v0  ;;  %v2610_v2 = vpop.f32.mrb[10].mxu0  ;;  %2635 = vmatprep.mubr.bf16.mxu1 %v215_v61 }
  0xfd   :  { %v207_v3 = vmax.f32 %v3199_v63, 0.0  ;;  %v3204_v4 = vadd.f32 %v2610_v2, %v2445_v33  ;;  %v169_v5 = vpop.f32.mrb[11].mxu0  ;;  %2636 = vmatmul.mubr.bf16.gmra.mrb[4].mxu1 %v216_v60  ;;  %v2803_v2 = vld [vmem:[#allocation2 + $0x40] sm:$0xff]  }
  0xfe   :  { %v205_v6 = vmax.f32 %v3201_v1, 0.0  ;;  %v3207_v7 = vadd.f32 %v2445_v33, %v169_v5  ;;  %2647 = vmatprep.subr.bf16.mxu0 %v2803_v2  ;;  %v2807_v1 = vld [vmem:[#allocation2 + $0x60] sm:$0xff]  }
  0xff   :  { %v208_v8 = vmax.f32 %v3204_v4, 0.0  ;;  %2648 = vmatpush3.bf16.msra.mxu0 %v2803_v2 }
 0x100   :  { %v206_v9 = vmax.f32 %v3207_v7, 0.0 }
 0x101   :  { %v218_v10 = vpack.c.bf16 %v208_v8, %v207_v3 }
 0x102   :  { %v217_v11 = vpack.c.bf16 %v206_v9, %v205_v6  ;;  %v2613_v12 = vpop.f32.mrb[12].mxu0 }
 0x103   :  { %v3219_v13 = vadd.f32 %v2613_v12, %v2445_v33  ;;  %v182_v14 = vpop.f32.mrb[13].mxu0 }
 0x104   :  { %v3221_v15 = vadd.f32 %v2445_v33, %v182_v14  ;;  %v2614_v16 = vpop.f32.mrb[14].mxu0  ;;  %2639 = vmatprep.mubr.bf16.mxu1 %v217_v11 }
 0x105   :  { %v211_v17 = vmax.f32 %v3219_v13, 0.0  ;;  %v3224_v18 = vadd.f32 %v2614_v16, %v2445_v33  ;;  %v185_v19 = vpop.f32.mrb[15].mxu0  ;;  %2640 = vmatmul.mubr.bf16.gmra.mrb[8].mxu1 %v218_v10  ;;  %v2804_v10 = vld [vmem:[#allocation2 + $0x48] sm:$0xff]  }
 0x106   :  { %v209_v20 = vmax.f32 %v3221_v15, 0.0  ;;  %v3227_v21 = vadd.f32 %v2445_v33, %v185_v19  ;;  %2649 = vmatprep.subr.bf16.mxu0 %v2804_v10  ;;  %v2805_v19 = vld [vmem:[#allocation2 + $0x50] sm:$0xff]  }
 0x107   :  { %v212_v22 = vmax.f32 %v3224_v18, 0.0  ;;  %2650 = vmatpush3.bf16.msra.mxu0 %v2804_v10 }
 0x108   :  { %v210_v23 = vmax.f32 %v3227_v21, 0.0  ;;  %2651 = vmatprep.subr.bf16.mxu0 %v2805_v19 }
 0x109   :  { %v220_v24 = vpack.c.bf16 %v212_v22, %v211_v17 }
 0x10a   :  { %v219_v25 = vpack.c.bf16 %v210_v23, %v209_v20 }
 0x10b   :  { %2652 = vmatpush3.bf16.msra.mxu0 %v2805_v19 }
 0x10c   :  { %2643 = vmatprep.mubr.bf16.mxu1 %v219_v25 }
 0x10d   :  { %2644 = vmatmul.mubr.bf16.gmra.mrb[12].mxu1 %v220_v24 }
 0x1c8   :  { %v2633_v26 = vpop.f32.mrb[0].mxu1 }
 0x1c9   :  { %v384_v28 = vadd.f32 %v2633_v26, %v199_v45  ;;  %v319_v29 = vpop.f32.mrb[1].mxu1 }
 0x1ca   :  { %v382_v30 = vadd.f32 %v319_v29, %v197_v43  ;;  %v2634_v31 = vpop.f32.mrb[2].mxu1 }
 0x1cb   :  { %v3245_v32 = vadd.f32 %v3242_v27, %v384_v28  ;;  %v385_v33 = vadd.f32 %v2634_v31, %v200_v42  ;;  %v322_v34 = vpop.f32.mrb[3].mxu1 }
 0x1cc   :  { %v3250_v35 = vadd.f32 %v3242_v27, %v382_v30  ;;  %v383_v37 = vadd.f32 %v322_v34, %v198_v44 }
 0x1cd   :  { %423 = vadd.xlane.f32.xlu1 %v3245_v32  ;;  %v3255_v36 = vadd.f32 %v3242_v27, %v385_v33  ;;  %v453_v40 = vmul.f32 %v3245_v32, %v3245_v32  ;;  %v2809_v33 = vld [vmem:[#allocation2 + $0x70] sm:$0xff]  }
 0x1ce   :  { %419 = vadd.xlane.f32.xlu0 %v3250_v35  ;;  %v3263_v43 = vadd.f32 %v3242_v27, %v383_v37  ;;  %v451_v50 = vmul.f32 %v3250_v35, %v3250_v35 }
 0x1cf   :  { %v454_v46 = vmul.f32 %v3255_v36, %v3255_v36 }
 0x1d0   :  { %v2637_v38 = vpop.f32.mrb[4].mxu1  ;;  %v452_v44 = vmul.f32 %v3263_v43, %v3263_v43 }
 0x1d1   :  { %425 = vadd.xlane.f32.xlu1 %v3255_v36  ;;  %v335_v39 = vpop.f32.mrb[5].mxu1  ;;  %v388_v47 = vadd.f32 %v2637_v38, %v203_v53 }
 0x1d2   :  { %471 = vadd.xlane.f32.xlu0 %v453_v40  ;;  %v2638_v42 = vpop.f32.mrb[6].mxu1  ;;  %v386_v49 = vadd.f32 %v335_v39, %v201_v56 }
 0x1d3   :  { %v338_v45 = vpop.f32.mrb[7].mxu1  ;;  %v389_v41 = vadd.f32 %v2638_v42, %v204_v58  ;;  %v3282_v61 = vadd.f32 %v3242_v27, %v388_v47 }
 0x1d4   :  { %v387_v54 = vadd.f32 %v338_v45, %v202_v59  ;;  %v3292_v62 = vadd.f32 %v3242_v27, %v386_v49 }
 0x1d5   :  { %473 = vadd.xlane.f32.xlu1 %v454_v46  ;;  %v3277_v60 = vadd.f32 %v3242_v27, %v389_v41  ;;  %v457_v5 = vmul.f32 %v3282_v61, %v3282_v61 }
 0x1d6   :  { %421 = vadd.xlane.f32.xlu0 %v3263_v43  ;;  %v3289_v53 = vadd.f32 %v3242_v27, %v387_v54  ;;  %v455_v16 = vmul.f32 %v3292_v62, %v3292_v62 }
 0x1d7   :  { %v458_v56 = vmul.f32 %v3277_v60, %v3277_v60 }
 0x1d8   :  { %v2641_v48 = vpop.f32.mrb[8].mxu1  ;;  %v456_v12 = vmul.f32 %v3289_v53, %v3289_v53 }
 0x1d9   :  { %469 = vadd.xlane.f32.xlu1 %v452_v44  ;;  %v351_v52 = vpop.f32.mrb[9].mxu1  ;;  %v392_v14 = vadd.f32 %v2641_v48, %v207_v3  ;;  %v2806_v3 = vld [vmem:[#allocation2 + $0x58] sm:$0xff]  }
 0x1da   :  { %467 = vadd.xlane.f32.xlu0 %v451_v50  ;;  %v2642_v55 = vpop.f32.mrb[10].mxu1  ;;  %v390_v63 = vadd.f32 %v351_v52, %v205_v6  ;;  %2653 = vmatprep.subr.bf16.mxu0 %v2806_v3 }
 0x1db   :  { %v354_v58 = vpop.f32.mrb[11].mxu1  ;;  %v393_v11 = vadd.f32 %v2642_v55, %v208_v8  ;;  %v3314_v8 = vadd.f32 %v3242_v27, %v392_v14  ;;  %2654 = vmatpush3.bf16.msra.mxu0 %v2806_v3 }
 0x1dc   :  { %v391_v4 = vadd.f32 %v354_v58, %v206_v9  ;;  %v3324_v26 = vadd.f32 %v3242_v27, %v390_v63  ;;  %2655 = vmatprep.subr.bf16.mxu0 %v2807_v1  ;;  %v2808_v9 = vld [vmem:[#allocation2 + $0x68] sm:$0xff]  }
 0x1dd   :  { %433 = vadd.xlane.f32.xlu1 %v3277_v60  ;;  %v3309_v24 = vadd.f32 %v3242_v27, %v393_v11  ;;  %v461_v7 = vmul.f32 %v3314_v8, %v3314_v8 }
 0x1de   :  { %431 = vadd.xlane.f32.xlu0 %v3282_v61  ;;  %v3321_v25 = vadd.f32 %v3242_v27, %v391_v4  ;;  %v459_v31 = vmul.f32 %v3324_v26, %v3324_v26 }
 0x1df   :  { %v462_v6 = vmul.f32 %v3309_v24, %v3309_v24  ;;  %2656 = vmatpush3.bf16.msra.mxu0 %v2807_v1 }
 0x1e0   :  { %v2645_v0 = vpop.f32.mrb[12].mxu1  ;;  %v460_v29 = vmul.f32 %v3321_v25, %v3321_v25  ;;  %2657 = vmatprep.subr.bf16.mxu0 %v2808_v9 }
 0x1e1   :  { %429 = vadd.xlane.f32.xlu1 %v3289_v53  ;;  %v367_v57 = vpop.f32.mrb[13].mxu1  ;;  %v396_v30 = vadd.f32 %v2645_v0, %v211_v17  ;;  %v2810_v17 = vld [vmem:[#allocation2 + $0x78] sm:$0xff]  }
 0x1e2   :  { %427 = vadd.xlane.f32.xlu0 %v3292_v62  ;;  %v2646_v59 = vpop.f32.mrb[14].mxu1  ;;  %v394_v13 = vadd.f32 %v367_v57, %v209_v20 }
 0x1e3   :  { %v370_v51 = vpop.f32.mrb[15].mxu1  ;;  %v397_v28 = vadd.f32 %v2646_v59, %v212_v22  ;;  %2658 = vmatpush3.bf16.msra.mxu0 %v2808_v9  ;;  %v3346_v22 = vadd.f32 %v3242_v27, %v396_v30 }
 0x1e4   :  { %v395_v18 = vadd.f32 %v370_v51, %v210_v23  ;;  %2659 = vmatprep.subr.bf16.mxu0 %v2809_v33  ;;  %v3356_v38 = vadd.f32 %v3242_v27, %v394_v13 }
 0x1e5   :  { %481 = vadd.xlane.f32.xlu1 %v458_v56  ;;  %v3341_v34 = vadd.f32 %v3242_v27, %v397_v28  ;;  %v465_v23 = vmul.f32 %v3346_v22, %v3346_v22 }
 0x1e6   :  { %479 = vadd.xlane.f32.xlu0 %v457_v5  ;;  %v3353_v37 = vadd.f32 %v3242_v27, %v395_v18  ;;  %v463_v20 = vmul.f32 %v3356_v38, %v3356_v38 }
 0x1e7   :  { %2660 = vmatpush3.bf16.msra.mxu0 %v2809_v33  ;;  %v466_v21 = vmul.f32 %v3341_v34, %v3341_v34 }
 0x1e8   :  { %2661 = vmatprep.subr.bf16.mxu0 %v2810_v17  ;;  %v464_v15 = vmul.f32 %v3353_v37, %v3353_v37 }
 0x1e9   :  { %477 = vadd.xlane.f32.xlu1 %v456_v12 }
 0x1ea   :  { %475 = vadd.xlane.f32.xlu0 %v455_v16 }
 0x1eb   :  { %2662 = vmatpush3.bf16.msra.mxu0 %v2810_v17 }
 0x1ed   :  { %441 = vadd.xlane.f32.xlu1 %v3309_v24 }
 0x1ee   :  { %439 = vadd.xlane.f32.xlu0 %v3314_v8 }
 0x1f1   :  { %437 = vadd.xlane.f32.xlu1 %v3321_v25 }
 0x1f2   :  { %435 = vadd.xlane.f32.xlu0 %v3324_v26 }
 0x1f5   :  { %489 = vadd.xlane.f32.xlu1 %v462_v6 }
 0x1f6   :  { %487 = vadd.xlane.f32.xlu0 %v461_v7 }
 0x1f9   :  { %485 = vadd.xlane.f32.xlu1 %v460_v29 }
 0x1fa   :  { %483 = vadd.xlane.f32.xlu0 %v459_v31 }
 0x1fd   :  { %449 = vadd.xlane.f32.xlu1 %v3341_v34 }
 0x1fe   :  { %447 = vadd.xlane.f32.xlu0 %v3346_v22 }
 0x201   :  { %445 = vadd.xlane.f32.xlu1 %v3353_v37 }
 0x202   :  { %443 = vadd.xlane.f32.xlu0 %v3356_v38 }
 0x205   :  { %493 = vadd.xlane.f32.xlu1 %v464_v15 }
 0x206   :  { %491 = vadd.xlane.f32.xlu0 %v463_v20 }
 0x209   :  { %497 = vadd.xlane.f32.xlu1 %v466_v21 }
 0x20a   :  { %495 = vadd.xlane.f32.xlu0 %v465_v23 }
 0x25a   :  { %v424_v27 = vpop.xlane.xlu1 %423 }
 0x25b   :  { %v420_v40 = vpop.xlane.xlu0 %419  ;;  %v501_v39 = vmul.f32 0.03125, %v424_v27 }
 0x25c   :  { %v3368_v54 = vmul.f32 0.03125, %v420_v40 }
 0x25d   :  { %v533_v41 = vmul.f32 %v501_v39, %v501_v39 }
 0x25e   :  { %v426_v42 = vpop.xlane.xlu1 %425  ;;  %v531_v10 = vmul.f32 %v3368_v54, %v3368_v54 }
 0x25f   :  { %v502_v45 = vmul.f32 0.03125, %v426_v42  ;;  %v472_v46 = vpop.xlane.xlu0 %471  ;;  %v581_v42 = vsub.f32 %v3245_v32, %v501_v39  ;;  %v579_v32 = vsub.f32 %v3250_v35, %v3368_v54 }
 0x260   :  { %v517_v44 = vmul.f32 0.03125, %v472_v46 }
 0x261   :  { %v534_v50 = vmul.f32 %v502_v45, %v502_v45  ;;  %v582_v15 = vsub.f32 %v3255_v36, %v502_v45 }
 0x262   :  { %v549_v47 = vsub.f32 %v517_v44, %v533_v41  ;;  %v474_v48 = vpop.xlane.xlu1 %473 }
 0x263   :  { %v518_v52 = vmul.f32 0.03125, %v474_v48  ;;  %v422_v55 = vpop.xlane.xlu0 %421 }
 0x264   :  { %v565_v58 = vmax.f32 %v549_v47, 0.0  ;;  %v500_v49 = vmul.f32 0.03125, %v422_v55 }
 0x265   :  { %v550_v0 = vsub.f32 %v518_v52, %v534_v50 }
 0x266   :  { %v597_v57 = vadd.f32 1e-05, %v565_v58  ;;  %v532_v59 = vmul.f32 %v500_v49, %v500_v49  ;;  %v470_v2 = vpop.xlane.xlu1 %469  ;;  %v580_v47 = vsub.f32 %v3263_v43, %v500_v49  ;;  %v3396_v43 = vld [vmem:[%s4553_s4 + $0x5] ss:$0 sm:$0xff] }
 0x267   :  { %v566_v51 = vmax.f32 %v550_v0, 0.0  ;;  %v516_v56 = vmul.f32 0.03125, %v470_v2  ;;  %v468_v5 = vpop.xlane.xlu0 %467 }
 0x268   :  { %v515_v11 = vmul.f32 0.03125, %v468_v5  ;;  %2835 = vrsqrt.f32 %v597_v57 }
 0x269   :  { %v598_v12 = vadd.f32 1e-05, %v566_v51  ;;  %v548_v14 = vsub.f32 %v516_v56, %v532_v59 }
 0x26a   :  { %v547_v16 = vsub.f32 %v515_v11, %v531_v10  ;;  %v434_v19 = vpop.xlane.xlu1 %433 }
 0x26b   :  { %2837 = vrsqrt.f32 %v598_v12  ;;  %v564_v4 = vmax.f32 %v548_v14, 0.0  ;;  %v432_v63 = vpop.xlane.xlu0 %431  ;;  %v3372_v9 = vmul.f32 0.03125, %v434_v19 }
 0x26c   :  { %v563_v3 = vmax.f32 %v547_v16, 0.0  ;;  %v3374_v29 = vmul.f32 0.03125, %v432_v63 }
 0x26d   :  { %v596_v1 = vadd.f32 1e-05, %v564_v4  ;;  %v538_v31 = vmul.f32 %v3372_v9, %v3372_v9  ;;  %v3404_v4 = vld [vmem:[%s4553_s4 + $0x9] ss:$0 sm:$0xff] }
 0x26e   :  { %v595_v6 = vadd.f32 1e-05, %v563_v3  ;;  %v430_v7 = vpop.xlane.xlu1 %429  ;;  %v537_v20 = vmul.f32 %v3374_v29, %v3374_v29 }
 0x26f   :  { %2839 = vrsqrt.f32 %v596_v1  ;;  %v428_v28 = vpop.xlane.xlu0 %427  ;;  %v3378_v33 = vmul.f32 0.03125, %v430_v7 }
 0x270   :  { %2841 = vrsqrt.f32 %v595_v6  ;;  %v3383_v21 = vmul.f32 0.03125, %v428_v28 }
 0x271   :  { %v536_v48 = vmul.f32 %v3378_v33, %v3378_v33 }
 0x272   :  { %v482_v30 = vpop.xlane.xlu1 %481  ;;  %v2836_v17 = vpop.eup %2835  ;;  %v535_v55 = vmul.f32 %v3383_v21, %v3383_v21 }
 0x273   :  { %v522_v18 = vmul.f32 0.03125, %v482_v30  ;;  %v480_v13 = vpop.xlane.xlu0 %479  ;;  %v629_v52 = vmul.f32 %v2836_v17, %v581_v42 }
 0x274   :  { %v521_v23 = vmul.f32 0.03125, %v480_v13 }
 0x275   :  { %v2838_v27 = vpop.eup %2837  ;;  %v554_v40 = vsub.f32 %v522_v18, %v538_v31  ;;  %v651_v16 = vmul.f32 %v3396_v43, %v629_v52 }
 0x276   :  { %v630_v46 = vmul.f32 %v2838_v27, %v582_v15  ;;  %v553_v41 = vsub.f32 %v521_v23, %v537_v20  ;;  %v478_v44 = vpop.xlane.xlu1 %477 }
 0x277   :  { %v570_v50 = vmax.f32 %v554_v40, 0.0  ;;  %v520_v36 = vmul.f32 0.03125, %v478_v44  ;;  %v476_v45 = vpop.xlane.xlu0 %475  ;;  %v3421_v13 = vadd.f32 %v3404_v4, %v651_v16 }
 0x278   :  { %v569_v58 = vmax.f32 %v553_v41, 0.0  ;;  %v519_v0 = vmul.f32 0.03125, %v476_v45  ;;  %v652_v10 = vmul.f32 %v3396_v43, %v630_v46  ;;  %v586_v46 = vsub.f32 %v3277_v60, %v3372_v9 }
 0x279   :  { %v2840_v57 = vpop.eup %2839  ;;  %v602_v39 = vadd.f32 1e-05, %v570_v50  ;;  %v552_v59 = vsub.f32 %v520_v36, %v536_v48  ;;  %v585_v50 = vsub.f32 %v3282_v61, %v3374_v29 }
 0x27a   :  { %v2842_v49 = vpop.eup %2841  ;;  %v601_v2 = vadd.f32 1e-05, %v569_v58  ;;  %v551_v51 = vsub.f32 %v519_v0, %v535_v55  ;;  %v442_v56 = vpop.xlane.xlu1 %441  ;;  %v628_v5 = vmul.f32 %v2840_v57, %v580_v47  ;;  %v3411_v7 = vadd.f32 %v3404_v4, %v652_v10 }
 0x27b   :  { %2843 = vrsqrt.f32 %v602_v39  ;;  %v568_v11 = vmax.f32 %v552_v59, 0.0  ;;  %v440_v12 = vpop.xlane.xlu0 %439  ;;  %v627_v14 = vmul.f32 %v2842_v49, %v579_v32  ;;  %v3413_v28 = vmul.f32 0.03125, %v442_v56 }
 0x27c   :  { %2845 = vrsqrt.f32 %v601_v2  ;;  %v567_v35 = vmax.f32 %v551_v51, 0.0  ;;  %v650_v54 = vmul.f32 %v3396_v43, %v628_v5  ;;  %v3418_v18 = vmul.f32 0.03125, %v440_v12 }
 0x27d   :  { %v600_v19 = vadd.f32 1e-05, %v568_v11  ;;  %v649_v63 = vmul.f32 %v3396_v43, %v627_v14  ;;  %v686_v20 = vpack.c.bf16 %v3411_v7, %v3421_v13  ;;  %v542_v23 = vmul.f32 %v3413_v28, %v3413_v28 }
 0x27e   :  { %v599_v3 = vadd.f32 1e-05, %v567_v35  ;;  %v438_v1 = vpop.xlane.xlu1 %437  ;;  %v3408_v6 = vadd.f32 %v3404_v4, %v650_v54  ;;  %v541_v41 = vmul.f32 %v3418_v18, %v3418_v18  ;;  %v584_v39 = vsub.f32 %v3289_v53, %v3378_v33 }
 0x27f   :  { %2847 = vrsqrt.f32 %v600_v19  ;;  %v436_v30 = vpop.xlane.xlu0 %435  ;;  %v3416_v31 = vadd.f32 %v3404_v4, %v649_v63  ;;  %v3429_v27 = vmul.f32 0.03125, %v438_v1  ;;  %v583_v2 = vsub.f32 %v3292_v62, %v3383_v21 }
 0x280   :  { %2849 = vrsqrt.f32 %v599_v3  ;;  %v3435_v44 = vmul.f32 0.03125, %v436_v30 }
 0x281   :  { %v685_v17 = vpack.c.bf16 %v3408_v6, %v3416_v31  ;;  %v540_v0 = vmul.f32 %v3429_v27, %v3429_v27 }
 0x282   :  { %v490_v15 = vpop.xlane.xlu1 %489  ;;  %v539_v59 = vmul.f32 %v3435_v44, %v3435_v44 }
 0x283   :  { %v526_v40 = vmul.f32 0.03125, %v490_v15  ;;  %2663 = vmatprep.mubr.bf16.mxu0 %v685_v17  ;;  %v488_v42 = vpop.xlane.xlu0 %487 }
 0x284   :  { %v525_v47 = vmul.f32 0.03125, %v488_v42  ;;  %2664 = vmatmul.mubr.bf16.vlgmr.msra.gmra.mrb[16].mxu0 %v686_v20 }
 0x285   :  { %v2844_v48 = vpop.eup %2843  ;;  %v558_v36 = vsub.f32 %v526_v40, %v542_v23 }
 0x286   :  { %v2846_v45 = vpop.eup %2845  ;;  %v557_v52 = vsub.f32 %v525_v47, %v541_v41  ;;  %v486_v55 = vpop.xlane.xlu1 %485  ;;  %v634_v58 = vmul.f32 %v2844_v48, %v586_v46 }
 0x287   :  { %v574_v60 = vmax.f32 %v558_v36, 0.0  ;;  %v524_v9 = vmul.f32 0.03125, %v486_v55  ;;  %v484_v57 = vpop.xlane.xlu0 %483  ;;  %v633_v32 = vmul.f32 %v2846_v45, %v585_v50 }
 0x288   :  { %v573_v49 = vmax.f32 %v557_v52, 0.0  ;;  %v523_v61 = vmul.f32 0.03125, %v484_v57  ;;  %v656_v35 = vmul.f32 %v3396_v43, %v634_v58  ;;  %v590_v52 = vsub.f32 %v3309_v24, %v3413_v28 }
 0x289   :  { %v2848_v29 = vpop.eup %2847  ;;  %v606_v51 = vadd.f32 1e-05, %v574_v60  ;;  %v556_v56 = vsub.f32 %v524_v9, %v540_v0  ;;  %v655_v16 = vmul.f32 %v3396_v43, %v633_v32  ;;  %v589_v9 = vsub.f32 %v3314_v8, %v3418_v18 }
 0x28a   :  { %v2850_v5 = vpop.eup %2849  ;;  %v605_v10 = vadd.f32 1e-05, %v573_v49  ;;  %v555_v11 = vsub.f32 %v523_v61, %v539_v59  ;;  %v450_v12 = vpop.xlane.xlu1 %449  ;;  %v632_v14 = vmul.f32 %v2848_v29, %v584_v39  ;;  %v3455_v17 = vadd.f32 %v3404_v4, %v656_v35 }
 0x28b   :  { %2851 = vrsqrt.f32 %v606_v51  ;;  %v572_v53 = vmax.f32 %v556_v56, 0.0  ;;  %v448_v33 = vpop.xlane.xlu0 %447  ;;  %v631_v54 = vmul.f32 %v2850_v5, %v583_v2  ;;  %v3463_v40 = vadd.f32 %v3404_v4, %v655_v16 }
 0x28c   :  { %2853 = vrsqrt.f32 %v605_v10  ;;  %v571_v19 = vmax.f32 %v555_v11, 0.0  ;;  %v654_v63 = vmul.f32 %v3396_v43, %v632_v14  ;;  %v3471_v48 = vmul.f32 0.03125, %v450_v12 }
 0x28d   :  { %v604_v62 = vadd.f32 1e-05, %v572_v53  ;;  %v653_v21 = vmul.f32 %v3396_v43, %v631_v54  ;;  %v688_v47 = vpack.c.bf16 %v3455_v17, %v3463_v40  ;;  %v3477_v55 = vmul.f32 0.03125, %v448_v33 }
 0x28e   :  { %v603_v3 = vadd.f32 1e-05, %v571_v19  ;;  %v446_v1 = vpop.xlane.xlu1 %445  ;;  %v3452_v30 = vadd.f32 %v3404_v4, %v654_v63  ;;  %v546_v61 = vmul.f32 %v3471_v48, %v3471_v48  ;;  %v588_v51 = vsub.f32 %v3321_v25, %v3429_v27 }
 0x28f   :  { %2855 = vrsqrt.f32 %v604_v62  ;;  %v3457_v15 = vmul.f32 0.03125, %v446_v1  ;;  %v444_v20 = vpop.xlane.xlu0 %443  ;;  %v3460_v23 = vadd.f32 %v3404_v4, %v653_v21  ;;  %v545_v56 = vmul.f32 %v3477_v55, %v3477_v55 }
 0x290   :  { %2857 = vrsqrt.f32 %v603_v3  ;;  %v3465_v42 = vmul.f32 0.03125, %v444_v20  ;;  %v587_v10 = vsub.f32 %v3324_v26, %v3435_v44 }
 0x291   :  { %v687_v46 = vpack.c.bf16 %v3452_v30, %v3460_v23  ;;  %v544_v50 = vmul.f32 %v3457_v15, %v3457_v15 }
 0x292   :  { %v494_v41 = vpop.xlane.xlu1 %493  ;;  %v543_v58 = vmul.f32 %v3465_v42, %v3465_v42 }
 0x293   :  { %v528_v36 = vmul.f32 0.03125, %v494_v41  ;;  %2667 = vmatprep.mubr.bf16.mxu0 %v687_v46  ;;  %v492_v45 = vpop.xlane.xlu0 %491 }
 0x294   :  { %v527_v0 = vmul.f32 0.03125, %v492_v45  ;;  %2668 = vmatmul.mubr.bf16.gmra.mrb[20].mxu0 %v688_v47  ;;  %v592_v47 = vsub.f32 %v3353_v37, %v3457_v15 }
 0x295   :  { %v2852_v60 = vpop.eup %2851  ;;  %v560_v57 = vsub.f32 %v528_v36, %v544_v50  ;;  %v591_v36 = vsub.f32 %v3356_v38, %v3465_v42 }
 0x296   :  { %v2854_v32 = vpop.eup %2853  ;;  %v559_v39 = vsub.f32 %v527_v0, %v543_v58  ;;  %v498_v59 = vpop.xlane.xlu1 %497  ;;  %v638_v49 = vmul.f32 %v2852_v60, %v590_v52  ;;  %v594_v0 = vsub.f32 %v3341_v34, %v3471_v48 }
 0x297   :  { %v576_v24 = vmax.f32 %v560_v57, 0.0  ;;  %v530_v28 = vmul.f32 0.03125, %v498_v59  ;;  %v496_v29 = vpop.xlane.xlu0 %495  ;;  %v637_v2 = vmul.f32 %v2854_v32, %v589_v9  ;;  %v593_v57 = vsub.f32 %v3346_v22, %v3477_v55 }
 0x298   :  { %v575_v5 = vmax.f32 %v559_v39, 0.0  ;;  %v529_v8 = vmul.f32 0.03125, %v496_v29  ;;  %v660_v14 = vmul.f32 %v3396_v43, %v638_v49 }
 0x299   :  { %v2856_v18 = vpop.eup %2855  ;;  %v608_v11 = vadd.f32 1e-05, %v576_v24  ;;  %v562_v12 = vsub.f32 %v530_v28, %v546_v61  ;;  %v659_v16 = vmul.f32 %v3396_v43, %v637_v2  ;;  %v3542_v24 = vld [vmem:[%s4553_s4 + $0x2] ss:$0 sm:$0xff] }
 0x29a   :  { %v2858_v35 = vpop.eup %2857  ;;  %v607_v53 = vadd.f32 1e-05, %v575_v5  ;;  %v561_v33 = vsub.f32 %v529_v8, %v545_v56  ;;  %v636_v54 = vmul.f32 %v2856_v18, %v588_v51  ;;  %v3502_v1 = vadd.f32 %v3404_v4, %v660_v14 }
 0x29b   :  { %2859 = vrsqrt.f32 %v608_v11  ;;  %v578_v25 = vmax.f32 %v562_v12, 0.0  ;;  %v635_v27 = vmul.f32 %v2858_v35, %v587_v10  ;;  %v3499_v3 = vadd.f32 %v3404_v4, %v659_v16 }
 0x29c   :  { %2861 = vrsqrt.f32 %v607_v53  ;;  %v577_v19 = vmax.f32 %v561_v33, 0.0  ;;  %v658_v63 = vmul.f32 %v3396_v43, %v636_v54 }
 0x29d   :  { %v610_v62 = vadd.f32 1e-05, %v578_v25  ;;  %v657_v26 = vmul.f32 %v3396_v43, %v635_v27  ;;  %v690_v41 = vpack.c.bf16 %v3502_v1, %v3499_v3 }
 0x29e   :  { %v609_v44 = vadd.f32 1e-05, %v577_v19  ;;  %v3496_v21 = vadd.f32 %v3404_v4, %v658_v63  ;;  %v2811_v63 = vld [vmem:[#allocation2 + $0x80] sm:$0xff]  }
 0x29f   :  { %2863 = vrsqrt.f32 %v610_v62  ;;  %v3505_v20 = vadd.f32 %v3404_v4, %v657_v26  ;;  %2679 = vmatprep.subr.bf16.mxu1 %v2811_v63 }
 0x2a0   :  { %2865 = vrsqrt.f32 %v609_v44  ;;  %2680 = vmatpush3.bf16.msra.mxu1 %v2811_v63 }
 0x2a1   :  { %v689_v46 = vpack.c.bf16 %v3496_v21, %v3505_v20 }
 0x2a3   :  { %2671 = vmatprep.mubr.bf16.mxu0 %v689_v46 }
 0x2a4   :  { %2672 = vmatmul.mubr.bf16.gmra.mrb[24].mxu0 %v690_v41 }
 0x2a5   :  { %v2860_v50 = vpop.eup %2859 }
 0x2a6   :  { %v2862_v45 = vpop.eup %2861  ;;  %v640_v52 = vmul.f32 %v2860_v50, %v592_v47 }
 0x2a7   :  { %v639_v58 = vmul.f32 %v2862_v45, %v591_v36 }
 0x2a8   :  { %v662_v60 = vmul.f32 %v3396_v43, %v640_v52  ;;  %v2812_v52 = vld [vmem:[#allocation2 + $0x88] sm:$0xff]  }
 0x2a9   :  { %v2864_v9 = vpop.eup %2863  ;;  %v661_v32 = vmul.f32 %v3396_v43, %v639_v58  ;;  %2681 = vmatprep.subr.bf16.mxu1 %v2812_v52 }
 0x2aa   :  { %v2866_v37 = vpop.eup %2865  ;;  %v3522_v15 = vadd.f32 %v3404_v4, %v662_v60  ;;  %v642_v39 = vmul.f32 %v2864_v9, %v594_v0  ;;  %2682 = vmatpush3.bf16.msra.mxu1 %v2812_v52  ;;  %v2814_v60 = vld [vmem:[#allocation2 + $0x98] sm:$0xff]  }
 0x2ab   :  { %v3525_v38 = vadd.f32 %v3404_v4, %v661_v32  ;;  %v641_v42 = vmul.f32 %v2866_v37, %v593_v57  ;;  %v2815_v37 = vld [vmem:[#allocation2 + $0xa0] sm:$0xff]  }
 0x2ac   :  { %v664_v59 = vmul.f32 %v3396_v43, %v642_v39 }
 0x2ad   :  { %v691_v34 = vpack.c.bf16 %v3522_v15, %v3525_v38  ;;  %v663_v48 = vmul.f32 %v3396_v43, %v641_v42 }
 0x2ae   :  { %v3532_v22 = vadd.f32 %v3404_v4, %v664_v59 }
 0x2af   :  { %2675 = vmatprep.mubr.bf16.mxu0 %v691_v34  ;;  %v3535_v55 = vadd.f32 %v3404_v4, %v663_v48 }
 0x2b1   :  { %v692_v49 = vpack.c.bf16 %v3532_v22, %v3535_v55 }
 0x2b3   :  { %2676 = vmatmul.mubr.bf16.gmra.mrb[28].mxu0 %v692_v49 }
 0x357   :  { %v2665_v61 = vpop.f32.mrb[16].mxu0 }
 0x358   :  { %v857_v28 = vadd.f32 %v2665_v61, %v3421_v13  ;;  %v792_v43 = vpop.f32.mrb[17].mxu0 }
 0x359   :  { %v2666_v29 = vpop.f32.mrb[18].mxu0  ;;  %v855_v4 = vadd.f32 %v792_v43, %v3416_v31  ;;  %v2816_v43 = vld [vmem:[#allocation2 + $0xa8] sm:$0xff]  }
 0x35a   :  { %v3546_v2 = vadd.f32 %v3542_v24, %v857_v28  ;;  %v858_v51 = vadd.f32 %v2666_v29, %v3411_v7  ;;  %v795_v56 = vpop.f32.mrb[19].mxu0 }
 0x35b   :  { %v856_v8 = vadd.f32 %v795_v56, %v3408_v6  ;;  %v3556_v18 = vadd.f32 %v3542_v24, %v855_v4 }
 0x35c   :  { %v3551_v5 = vadd.f32 %v3542_v24, %v858_v51  ;;  %896 = vadd.xlane.f32.xlu0 %v3546_v2  ;;  %v926_v7 = vmul.f32 %v3546_v2, %v3546_v2 }
 0x35d   :  { %v3560_v13 = vadd.f32 %v3542_v24, %v856_v8  ;;  %v924_v31 = vmul.f32 %v3556_v18, %v3556_v18 }
 0x35e   :  { %898 = vadd.xlane.f32.xlu1 %v3551_v5  ;;  %v927_v6 = vmul.f32 %v3551_v5, %v3551_v5 }
 0x35f   :  { %v925_v14 = vmul.f32 %v3560_v13, %v3560_v13 }
 0x360   :  { %892 = vadd.xlane.f32.xlu0 %v3556_v18 }
 0x362   :  { %894 = vadd.xlane.f32.xlu1 %v3560_v13 }
 0x364   :  { %944 = vadd.xlane.f32.xlu0 %v926_v7 }
 0x366   :  { %946 = vadd.xlane.f32.xlu1 %v927_v6 }
 0x367   :  { %v2669_v10 = vpop.f32.mrb[20].mxu0 }
 0x368   :  { %v861_v11 = vadd.f32 %v2669_v10, %v3463_v40  ;;  %v808_v12 = vpop.f32.mrb[21].mxu0  ;;  %940 = vadd.xlane.f32.xlu0 %v924_v31 }
 0x369   :  { %v2670_v35 = vpop.f32.mrb[22].mxu0  ;;  %v859_v33 = vadd.f32 %v808_v12, %v3460_v23 }
 0x36a   :  { %v3574_v53 = vadd.f32 %v3542_v24, %v861_v11  ;;  %v862_v54 = vadd.f32 %v2670_v35, %v3455_v17  ;;  %v811_v16 = vpop.f32.mrb[23].mxu0  ;;  %942 = vadd.xlane.f32.xlu1 %v925_v14 }
 0x36b   :  { %v860_v40 = vadd.f32 %v811_v16, %v3452_v30  ;;  %v3584_v27 = vadd.f32 %v3542_v24, %v859_v33 }
 0x36c   :  { %v3579_v25 = vadd.f32 %v3542_v24, %v862_v54  ;;  %904 = vadd.xlane.f32.xlu0 %v3574_v53  ;;  %v930_v17 = vmul.f32 %v3574_v53, %v3574_v53 }
 0x36d   :  { %v3588_v19 = vadd.f32 %v3542_v24, %v860_v40  ;;  %v928_v23 = vmul.f32 %v3584_v27, %v3584_v27 }
 0x36e   :  { %906 = vadd.xlane.f32.xlu1 %v3579_v25  ;;  %v931_v30 = vmul.f32 %v3579_v25, %v3579_v25 }
 0x36f   :  { %v929_v46 = vmul.f32 %v3588_v19, %v3588_v19 }
 0x370   :  { %900 = vadd.xlane.f32.xlu0 %v3584_v27 }
 0x372   :  { %902 = vadd.xlane.f32.xlu1 %v3588_v19 }
 0x374   :  { %952 = vadd.xlane.f32.xlu0 %v930_v17 }
 0x376   :  { %954 = vadd.xlane.f32.xlu1 %v931_v30 }
 0x377   :  { %v2673_v62 = vpop.f32.mrb[24].mxu0 }
 0x378   :  { %v865_v26 = vadd.f32 %v2673_v62, %v3499_v3  ;;  %v824_v44 = vpop.f32.mrb[25].mxu0  ;;  %948 = vadd.xlane.f32.xlu0 %v928_v23 }
 0x379   :  { %v2674_v41 = vpop.f32.mrb[26].mxu0  ;;  %v863_v50 = vadd.f32 %v824_v44, %v3505_v20  ;;  %v2813_v20 = vld [vmem:[#allocation2 + $0x90] sm:$0xff]  }
 0x37a   :  { %v3602_v47 = vadd.f32 %v3542_v24, %v865_v26  ;;  %v866_v36 = vadd.f32 %v2674_v41, %v3502_v1  ;;  %v827_v45 = vpop.f32.mrb[27].mxu0  ;;  %950 = vadd.xlane.f32.xlu1 %v929_v46  ;;  %2683 = vmatprep.subr.bf16.mxu1 %v2813_v20 }
 0x37b   :  { %v864_v58 = vadd.f32 %v827_v45, %v3496_v21  ;;  %v3612_v0 = vadd.f32 %v3542_v24, %v863_v50  ;;  %2684 = vmatpush3.bf16.msra.mxu1 %v2813_v20 }
 0x37c   :  { %v3607_v3 = vadd.f32 %v3542_v24, %v866_v36  ;;  %912 = vadd.xlane.f32.xlu0 %v3602_v47  ;;  %v934_v21 = vmul.f32 %v3602_v47, %v3602_v47  ;;  %2685 = vmatprep.subr.bf16.mxu1 %v2814_v60 }
 0x37d   :  { %v3616_v1 = vadd.f32 %v3542_v24, %v864_v58  ;;  %v932_v32 = vmul.f32 %v3612_v0, %v3612_v0 }
 0x37e   :  { %914 = vadd.xlane.f32.xlu1 %v3607_v3  ;;  %v935_v9 = vmul.f32 %v3607_v3, %v3607_v3 }
 0x37f   :  { %2686 = vmatpush3.bf16.msra.mxu1 %v2814_v60  ;;  %v933_v34 = vmul.f32 %v3616_v1, %v3616_v1 }
 0x380   :  { %908 = vadd.xlane.f32.xlu0 %v3612_v0  ;;  %2687 = vmatprep.subr.bf16.mxu1 %v2815_v37 }
 0x382   :  { %910 = vadd.xlane.f32.xlu1 %v3616_v1 }
 0x383   :  { %2688 = vmatpush3.bf16.msra.mxu1 %v2815_v37 }
 0x384   :  { %960 = vadd.xlane.f32.xlu0 %v934_v21  ;;  %2689 = vmatprep.subr.bf16.mxu1 %v2816_v43 }
 0x386   :  { %962 = vadd.xlane.f32.xlu1 %v935_v9  ;;  %v2677_v57 = vpop.f32.mrb[28].mxu0 }
 0x387   :  { %v869_v39 = vadd.f32 %v2677_v57, %v3535_v55  ;;  %v840_v42 = vpop.f32.mrb[29].mxu0  ;;  %2690 = vmatpush3.bf16.msra.mxu1 %v2816_v43 }
 0x388   :  { %956 = vadd.xlane.f32.xlu0 %v932_v32  ;;  %v2678_v59 = vpop.f32.mrb[30].mxu0  ;;  %v867_v28 = vadd.f32 %v840_v42, %v3525_v38  ;;  %v2818_v38 = vld [vmem:[#allocation2 + $0xb8] sm:$0xff]  }
 0x389   :  { %v3630_v48 = vadd.f32 %v3542_v24, %v869_v39  ;;  %v870_v49 = vadd.f32 %v2678_v59, %v3532_v22  ;;  %v843_v61 = vpop.f32.mrb[31].mxu0  ;;  %v2817_v22 = vld [vmem:[#allocation2 + $0xb0] sm:$0xff]  }
 0x38a   :  { %958 = vadd.xlane.f32.xlu1 %v933_v34  ;;  %v868_v29 = vadd.f32 %v843_v61, %v3522_v15  ;;  %v3640_v4 = vadd.f32 %v3542_v24, %v867_v28  ;;  %2691 = vmatprep.subr.bf16.mxu1 %v2817_v22 }
 0x38b   :  { %v3635_v55 = vadd.f32 %v3542_v24, %v870_v49  ;;  %2692 = vmatpush3.bf16.msra.mxu1 %v2817_v22 }
 0x38c   :  { %920 = vadd.xlane.f32.xlu0 %v3630_v48  ;;  %v3644_v51 = vadd.f32 %v3542_v24, %v868_v29  ;;  %v936_v15 = vmul.f32 %v3640_v4, %v3640_v4  ;;  %2693 = vmatprep.subr.bf16.mxu1 %v2818_v38  ;;  %v938_v24 = vmul.f32 %v3630_v48, %v3630_v48 }
 0x38d   :  { %v939_v8 = vmul.f32 %v3635_v55, %v3635_v55 }
 0x38e   :  { %922 = vadd.xlane.f32.xlu1 %v3635_v55  ;;  %v937_v56 = vmul.f32 %v3644_v51, %v3644_v51 }
 0x38f   :  { %2694 = vmatpush3.bf16.msra.mxu1 %v2818_v38 }
 0x390   :  { %916 = vadd.xlane.f32.xlu0 %v3640_v4 }
 0x392   :  { %918 = vadd.xlane.f32.xlu1 %v3644_v51 }
 0x394   :  { %964 = vadd.xlane.f32.xlu0 %v936_v15 }
 0x396   :  { %966 = vadd.xlane.f32.xlu1 %v937_v56 }
 0x398   :  { %968 = vadd.xlane.f32.xlu0 %v938_v24 }
 0x39a   :  { %970 = vadd.xlane.f32.xlu1 %v939_v8 }
 0x3e9   :  { %v897_v7 = vpop.xlane.xlu0 %896 }
 0x3ea   :  { %v974_v10 = vmul.f32 0.03125, %v897_v7 }
 0x3eb   :  { %v899_v6 = vpop.xlane.xlu1 %898 }
 0x3ec   :  { %v975_v12 = vmul.f32 0.03125, %v899_v6  ;;  %v1006_v35 = vmul.f32 %v974_v10, %v974_v10  ;;  %v1054_v7 = vsub.f32 %v3546_v2, %v974_v10 }
 0x3ed   :  { %v893_v31 = vpop.xlane.xlu0 %892 }
 0x3ee   :  { %v3656_v33 = vmul.f32 0.03125, %v893_v31  ;;  %v1007_v17 = vmul.f32 %v975_v12, %v975_v12  ;;  %v1055_v6 = vsub.f32 %v3551_v5, %v975_v12 }
 0x3ef   :  { %v895_v11 = vpop.xlane.xlu1 %894 }
 0x3f0   :  { %v3658_v16 = vmul.f32 0.03125, %v895_v11  ;;  %v1004_v62 = vmul.f32 %v3656_v33, %v3656_v33 }
 0x3f1   :  { %v945_v14 = vpop.xlane.xlu0 %944 }
 0x3f2   :  { %v990_v54 = vmul.f32 0.03125, %v945_v14  ;;  %v1005_v41 = vmul.f32 %v3658_v16, %v3658_v16 }
 0x3f3   :  { %v947_v40 = vpop.xlane.xlu1 %946 }
 0x3f4   :  { %v1022_v30 = vsub.f32 %v990_v54, %v1006_v35  ;;  %v991_v23 = vmul.f32 0.03125, %v947_v40 }
 0x3f5   :  { %v941_v63 = vpop.xlane.xlu0 %940 }
 0x3f6   :  { %v1038_v26 = vmax.f32 %v1022_v30, 0.0  ;;  %v1023_v44 = vsub.f32 %v991_v23, %v1007_v17  ;;  %v988_v46 = vmul.f32 0.03125, %v941_v63  ;;  %v1052_v17 = vsub.f32 %v3556_v18, %v3656_v33 }
 0x3f7   :  { %v943_v50 = vpop.xlane.xlu1 %942 }
 0x3f8   :  { %v1070_v36 = vadd.f32 1e-05, %v1038_v26  ;;  %v1039_v45 = vmax.f32 %v1023_v44, 0.0  ;;  %v1020_v52 = vsub.f32 %v988_v46, %v1004_v62  ;;  %v989_v58 = vmul.f32 0.03125, %v943_v50  ;;  %v3687_v44 = vld [vmem:[%s4553_s4 + $0x6] ss:$0 sm:$0xff] }
 0x3f9   :  { %v905_v20 = vpop.xlane.xlu0 %904  ;;  %v1053_v46 = vsub.f32 %v3560_v13, %v3658_v16  ;;  %v3697_v13 = vld [vmem:[%s4553_s4 + $0xa] ss:$0 sm:$0xff] }
 0x3fa   :  { %2867 = vrsqrt.f32 %v1070_v36  ;;  %v1071_v21 = vadd.f32 1e-05, %v1039_v45  ;;  %v1036_v60 = vmax.f32 %v1020_v52, 0.0  ;;  %v1021_v9 = vsub.f32 %v989_v58, %v1005_v41 }
 0x3fb   :  { %v907_v57 = vpop.xlane.xlu1 %906  ;;  %v3664_v59 = vmul.f32 0.03125, %v905_v20 }
 0x3fc   :  { %2869 = vrsqrt.f32 %v1071_v21  ;;  %v1068_v32 = vadd.f32 1e-05, %v1036_v60  ;;  %v1037_v37 = vmax.f32 %v1021_v9, 0.0  ;;  %v3666_v49 = vmul.f32 0.03125, %v907_v57 }
 0x3fd   :  { %v901_v39 = vpop.xlane.xlu0 %900  ;;  %v1010_v28 = vmul.f32 %v3664_v59, %v3664_v59 }
 0x3fe   :  { %2871 = vrsqrt.f32 %v1068_v32  ;;  %v1069_v42 = vadd.f32 1e-05, %v1037_v37  ;;  %v3670_v43 = vmul.f32 0.03125, %v901_v39  ;;  %v1011_v56 = vmul.f32 %v3666_v49, %v3666_v49 }
 0x3ff   :  { %v903_v34 = vpop.xlane.xlu1 %902 }
 0x400   :  { %2873 = vrsqrt.f32 %v1069_v42  ;;  %v3672_v22 = vmul.f32 0.03125, %v903_v34  ;;  %v1008_v14 = vmul.f32 %v3670_v43, %v3670_v43 }
 0x401   :  { %v953_v61 = vpop.xlane.xlu0 %952 }
 0x402   :  { %v994_v29 = vmul.f32 0.03125, %v953_v61  ;;  %v1009_v63 = vmul.f32 %v3672_v22, %v3672_v22 }
 0x403   :  { %v955_v38 = vpop.xlane.xlu1 %954 }
 0x404   :  { %v2868_v15 = vpop.eup %2867  ;;  %v1026_v24 = vsub.f32 %v994_v29, %v1010_v28  ;;  %v995_v8 = vmul.f32 0.03125, %v955_v38 }
 0x405   :  { %v949_v31 = vpop.xlane.xlu0 %948  ;;  %v1102_v30 = vmul.f32 %v2868_v15, %v1054_v7 }
 0x406   :  { %v2870_v11 = vpop.eup %2869  ;;  %v1042_v35 = vmax.f32 %v1026_v24, 0.0  ;;  %v1027_v54 = vsub.f32 %v995_v8, %v1011_v56  ;;  %v992_v40 = vmul.f32 0.03125, %v949_v31 }
 0x407   :  { %v1103_v23 = vmul.f32 %v2870_v11, %v1055_v6  ;;  %v951_v62 = vpop.xlane.xlu1 %950  ;;  %v1124_v57 = vmul.f32 %v3687_v44, %v1102_v30  ;;  %v1059_v30 = vsub.f32 %v3579_v25, %v3666_v49 }
 0x408   :  { %v2872_v2 = vpop.eup %2871  ;;  %v1074_v10 = vadd.f32 1e-05, %v1042_v35  ;;  %v1043_v5 = vmax.f32 %v1027_v54, 0.0  ;;  %v1024_v12 = vsub.f32 %v992_v40, %v1008_v14  ;;  %v993_v26 = vmul.f32 0.03125, %v951_v62 }
 0x409   :  { %v913_v18 = vpop.xlane.xlu0 %912  ;;  %v1100_v33 = vmul.f32 %v2872_v2, %v1052_v17  ;;  %v1125_v41 = vmul.f32 %v3687_v44, %v1103_v23  ;;  %v3714_v38 = vadd.f32 %v3697_v13, %v1124_v57  ;;  %v1058_v17 = vsub.f32 %v3574_v53, %v3664_v59 }
 0x40a   :  { %v2874_v50 = vpop.eup %2873  ;;  %2875 = vrsqrt.f32 %v1074_v10  ;;  %v1075_v36 = vadd.f32 1e-05, %v1043_v5  ;;  %v1040_v45 = vmax.f32 %v1024_v12, 0.0  ;;  %v1025_v52 = vsub.f32 %v993_v26, %v1009_v63 }
 0x40b   :  { %v915_v58 = vpop.xlane.xlu1 %914  ;;  %v1101_v20 = vmul.f32 %v2874_v50, %v1053_v46  ;;  %v1122_v21 = vmul.f32 %v3687_v44, %v1100_v33  ;;  %v3700_v39 = vmul.f32 0.03125, %v913_v18  ;;  %v3703_v42 = vadd.f32 %v3697_v13, %v1125_v41 }
 0x40c   :  { %2877 = vrsqrt.f32 %v1075_v36  ;;  %v1072_v60 = vadd.f32 1e-05, %v1040_v45  ;;  %v1041_v9 = vmax.f32 %v1025_v52, 0.0  ;;  %v3711_v29 = vmul.f32 0.03125, %v915_v58 }
 0x40d   :  { %v909_v32 = vpop.xlane.xlu0 %908  ;;  %v1123_v16 = vmul.f32 %v3687_v44, %v1101_v20  ;;  %v3706_v61 = vadd.f32 %v3697_v13, %v1122_v21  ;;  %v1014_v24 = vmul.f32 %v3700_v39, %v3700_v39  ;;  %v1159_v6 = vpack.c.bf16 %v3703_v42, %v3714_v38 }
 0x40e   :  { %2879 = vrsqrt.f32 %v1072_v60  ;;  %v1073_v37 = vadd.f32 1e-05, %v1041_v9  ;;  %v3720_v8 = vmul.f32 0.03125, %v909_v32  ;;  %v1015_v35 = vmul.f32 %v3711_v29, %v3711_v29 }
 0x40f   :  { %v911_v34 = vpop.xlane.xlu1 %910  ;;  %v3709_v28 = vadd.f32 %v3697_v13, %v1123_v16  ;;  %v1056_v12 = vsub.f32 %v3584_v27, %v3670_v43  ;;  %v1057_v50 = vsub.f32 %v3588_v19, %v3672_v22 }
 0x410   :  { %2881 = vrsqrt.f32 %v1073_v37  ;;  %v3724_v31 = vmul.f32 0.03125, %v911_v34  ;;  %v1012_v62 = vmul.f32 %v3720_v8, %v3720_v8 }
 0x411   :  { %v961_v15 = vpop.xlane.xlu0 %960  ;;  %v1158_v56 = vpack.c.bf16 %v3709_v28, %v3706_v61 }
 0x412   :  { %v998_v7 = vmul.f32 0.03125, %v961_v15  ;;  %v1013_v26 = vmul.f32 %v3724_v31, %v3724_v31 }
 0x413   :  { %2695 = vmatprep.mubr.bf16.mxu1 %v1158_v56  ;;  %v963_v11 = vpop.xlane.xlu1 %962 }
 0x414   :  { %v2876_v14 = vpop.eup %2875  ;;  %v1030_v54 = vsub.f32 %v998_v7, %v1014_v24  ;;  %v999_v40 = vmul.f32 0.03125, %v963_v11  ;;  %2696 = vmatmul.mubr.bf16.vlgmr.msra.gmra.mrb[16].mxu1 %v1159_v6 }
 0x415   :  { %v957_v23 = vpop.xlane.xlu0 %956  ;;  %v1106_v18 = vmul.f32 %v2876_v14, %v1058_v17 }
 0x416   :  { %v2878_v63 = vpop.eup %2877  ;;  %v1046_v2 = vmax.f32 %v1030_v54, 0.0  ;;  %v1031_v10 = vsub.f32 %v999_v40, %v1015_v35  ;;  %v996_v5 = vmul.f32 0.03125, %v957_v23 }
 0x417   :  { %v959_v46 = vpop.xlane.xlu1 %958  ;;  %v1107_v53 = vmul.f32 %v2878_v63, %v1059_v30  ;;  %v1128_v16 = vmul.f32 %v3687_v44, %v1106_v18 }
 0x418   :  { %v2880_v59 = vpop.eup %2879  ;;  %v1078_v33 = vadd.f32 1e-05, %v1046_v2  ;;  %v1047_v25 = vmax.f32 %v1031_v10, 0.0  ;;  %v1028_v49 = vsub.f32 %v996_v5, %v1012_v62  ;;  %v997_v41 = vmul.f32 0.03125, %v959_v46 }
 0x419   :  { %v921_v36 = vpop.xlane.xlu0 %920  ;;  %v1104_v45 = vmul.f32 %v2880_v59, %v1056_v12  ;;  %v1129_v52 = vmul.f32 %v3687_v44, %v1107_v53  ;;  %v3758_v11 = vadd.f32 %v3697_v13, %v1128_v16  ;;  %v1062_v12 = vsub.f32 %v3602_v47, %v3700_v39 }
 0x41a   :  { %v2882_v58 = vpop.eup %2881  ;;  %2883 = vrsqrt.f32 %v1078_v33  ;;  %v1079_v27 = vadd.f32 1e-05, %v1047_v25  ;;  %v1044_v43 = vmax.f32 %v1028_v49, 0.0  ;;  %v1029_v20 = vsub.f32 %v997_v41, %v1013_v26 }
 0x41b   :  { %v923_v21 = vpop.xlane.xlu1 %922  ;;  %v1105_v60 = vmul.f32 %v2882_v58, %v1057_v50  ;;  %v1126_v9 = vmul.f32 %v3687_v44, %v1104_v45  ;;  %v3745_v34 = vadd.f32 %v3697_v13, %v1129_v52  ;;  %v3762_v54 = vmul.f32 0.03125, %v921_v36 }
 0x41c   :  { %2885 = vrsqrt.f32 %v1079_v27  ;;  %v1076_v57 = vadd.f32 1e-05, %v1044_v43  ;;  %v1045_v32 = vmax.f32 %v1029_v20, 0.0  ;;  %v3768_v23 = vmul.f32 0.03125, %v923_v21 }
 0x41d   :  { %v917_v37 = vpop.xlane.xlu0 %916  ;;  %v1127_v19 = vmul.f32 %v3687_v44, %v1105_v60  ;;  %v3750_v24 = vadd.f32 %v3697_v13, %v1126_v9  ;;  %v1161_v30 = vpack.c.bf16 %v3745_v34, %v3758_v11  ;;  %v1063_v26 = vsub.f32 %v3607_v3, %v3711_v29 }
 0x41e   :  { %2887 = vrsqrt.f32 %v1076_v57  ;;  %v1077_v22 = vadd.f32 1e-05, %v1045_v32  ;;  %v3747_v15 = vmul.f32 0.03125, %v917_v37  ;;  %v1018_v53 = vmul.f32 %v3762_v54, %v3762_v54 }
 0x41f   :  { %v919_v56 = vpop.xlane.xlu1 %918  ;;  %v3753_v7 = vadd.f32 %v3697_v13, %v1127_v19  ;;  %v1060_v49 = vsub.f32 %v3612_v0, %v3720_v8  ;;  %v1019_v41 = vmul.f32 %v3768_v23, %v3768_v23  ;;  %v1061_v58 = vsub.f32 %v3616_v1, %v3724_v31 }
 0x420   :  { %2889 = vrsqrt.f32 %v1077_v22  ;;  %v3755_v6 = vmul.f32 0.03125, %v919_v56  ;;  %v1016_v40 = vmul.f32 %v3747_v15, %v3747_v15 }
 0x421   :  { %v965_v14 = vpop.xlane.xlu0 %964  ;;  %v1160_v35 = vpack.c.bf16 %v3753_v7, %v3750_v24 }
 0x422   :  { %v1000_v17 = vmul.f32 0.03125, %v965_v14  ;;  %v1017_v2 = vmul.f32 %v3755_v6, %v3755_v6 }
 0x423   :  { %2699 = vmatprep.mubr.bf16.mxu1 %v1160_v35  ;;  %v967_v63 = vpop.xlane.xlu1 %966 }
 0x424   :  { %v2884_v62 = vpop.eup %2883  ;;  %v1032_v10 = vsub.f32 %v1000_v17, %v1016_v40  ;;  %v1001_v5 = vmul.f32 0.03125, %v967_v63  ;;  %2700 = vmatmul.mubr.bf16.gmra.mrb[20].mxu1 %v1161_v30  ;;  %v1064_v40 = vsub.f32 %v3640_v4, %v3747_v15  ;;  %v1065_v30 = vsub.f32 %v3644_v51, %v3755_v6 }
 0x425   :  { %v969_v46 = vpop.xlane.xlu0 %968  ;;  %v1110_v36 = vmul.f32 %v2884_v62, %v1062_v12 }
 0x426   :  { %v2886_v18 = vpop.eup %2885  ;;  %v1048_v59 = vmax.f32 %v1032_v10, 0.0  ;;  %v1033_v33 = vsub.f32 %v1001_v5, %v1017_v2  ;;  %v1002_v25 = vmul.f32 0.03125, %v969_v46  ;;  %v1066_v2 = vsub.f32 %v3630_v48, %v3762_v54 }
 0x427   :  { %v971_v50 = vpop.xlane.xlu1 %970  ;;  %v1111_v47 = vmul.f32 %v2886_v18, %v1063_v26  ;;  %v1132_v16 = vmul.f32 %v3687_v44, %v1110_v36  ;;  %v1067_v26 = vsub.f32 %v3635_v55, %v3768_v23 }
 0x428   :  { %v2888_v39 = vpop.eup %2887  ;;  %v1080_v45 = vadd.f32 1e-05, %v1048_v59  ;;  %v1049_v3 = vmax.f32 %v1033_v33, 0.0  ;;  %v1034_v29 = vsub.f32 %v1002_v25, %v1018_v53  ;;  %v1003_v52 = vmul.f32 0.03125, %v971_v50  ;;  %v3835_v25 = vld [vmem:[%s4553_s4 + $0x3] ss:$0 sm:$0xff] }
 0x429   :  { %v1108_v27 = vmul.f32 %v2888_v39, %v1060_v49  ;;  %v1133_v43 = vmul.f32 %v3687_v44, %v1111_v47  ;;  %v3798_v56 = vadd.f32 %v3697_v13, %v1132_v16 }
 0x42a   :  { %v2890_v20 = vpop.eup %2889  ;;  %2891 = vrsqrt.f32 %v1080_v45  ;;  %v1081_v0 = vadd.f32 1e-05, %v1049_v3  ;;  %v1050_v8 = vmax.f32 %v1034_v29, 0.0  ;;  %v1035_v21 = vsub.f32 %v1003_v52, %v1019_v41 }
 0x42b   :  { %v1109_v60 = vmul.f32 %v2890_v20, %v1061_v58  ;;  %v1130_v9 = vmul.f32 %v3687_v44, %v1108_v27  ;;  %v3789_v31 = vadd.f32 %v3697_v13, %v1133_v43 }
 0x42c   :  { %2893 = vrsqrt.f32 %v1081_v0  ;;  %v1082_v57 = vadd.f32 1e-05, %v1050_v8  ;;  %v1051_v32 = vmax.f32 %v1035_v21, 0.0 }
 0x42d   :  { %v1131_v37 = vmul.f32 %v3687_v44, %v1109_v60  ;;  %v3792_v19 = vadd.f32 %v3697_v13, %v1130_v9  ;;  %v1163_v35 = vpack.c.bf16 %v3789_v31, %v3798_v56 }
 0x42e   :  { %2895 = vrsqrt.f32 %v1082_v57  ;;  %v1083_v1 = vadd.f32 1e-05, %v1051_v32  ;;  %v2819_v32 = vld [vmem:[#allocation2 + $0xc0] sm:$0xff]  }
 0x42f   :  { %v3795_v22 = vadd.f32 %v3697_v13, %v1131_v37  ;;  %2711 = vmatprep.subr.bf16.mxu0 %v2819_v32 }
 0x430   :  { %2897 = vrsqrt.f32 %v1083_v1  ;;  %2712 = vmatpush3.bf16.msra.mxu0 %v2819_v32 }
 0x431   :  { %v1162_v14 = vpack.c.bf16 %v3795_v22, %v3792_v19 }
 0x433   :  { %2703 = vmatprep.mubr.bf16.mxu1 %v1162_v14 }
 0x434   :  { %v2892_v17 = vpop.eup %2891  ;;  %2704 = vmatmul.mubr.bf16.gmra.mrb[24].mxu1 %v1163_v35 }
 0x435   :  { %v1112_v63 = vmul.f32 %v2892_v17, %v1064_v40 }
 0x436   :  { %v2894_v62 = vpop.eup %2893 }
 0x437   :  { %v1113_v10 = vmul.f32 %v2894_v62, %v1065_v30  ;;  %v1134_v5 = vmul.f32 %v3687_v44, %v1112_v63  ;;  %v2820_v62 = vld [vmem:[#allocation2 + $0xc8] sm:$0xff]  }
 0x438   :  { %v2896_v12 = vpop.eup %2895  ;;  %2713 = vmatprep.subr.bf16.mxu0 %v2820_v62 }
 0x439   :  { %v1135_v4 = vmul.f32 %v3687_v44, %v1113_v10  ;;  %v1114_v15 = vmul.f32 %v2896_v12, %v1066_v2  ;;  %v3815_v18 = vadd.f32 %v3697_v13, %v1134_v5  ;;  %2714 = vmatpush3.bf16.msra.mxu0 %v2820_v62  ;;  %v2822_v5 = vld [vmem:[#allocation2 + $0xd8] sm:$0xff]  }
 0x43a   :  { %v2898_v46 = vpop.eup %2897 }
 0x43b   :  { %v3818_v51 = vadd.f32 %v3697_v13, %v1135_v4  ;;  %v1115_v6 = vmul.f32 %v2898_v46, %v1067_v26  ;;  %v1136_v48 = vmul.f32 %v3687_v44, %v1114_v15  ;;  %v2823_v15 = vld [vmem:[#allocation2 + $0xe0] sm:$0xff]  }
 0x43d   :  { %v1164_v54 = vpack.c.bf16 %v3818_v51, %v3815_v18  ;;  %v1137_v53 = vmul.f32 %v3687_v44, %v1115_v6  ;;  %v3825_v55 = vadd.f32 %v3697_v13, %v1136_v48 }
 0x43f   :  { %2707 = vmatprep.mubr.bf16.mxu1 %v1164_v54  ;;  %v3828_v23 = vadd.f32 %v3697_v13, %v1137_v53 }
 0x441   :  { %v1165_v59 = vpack.c.bf16 %v3828_v23, %v3825_v55 }
 0x443   :  { %2708 = vmatmul.mubr.bf16.gmra.mrb[28].mxu1 %v1165_v59 }
 0x4e7   :  { %v2697_v33 = vpop.f32.mrb[16].mxu1 }
 0x4e8   :  { %v1330_v49 = vadd.f32 %v2697_v33, %v3714_v38  ;;  %v1265_v44 = vpop.f32.mrb[17].mxu1 }
 0x4e9   :  { %v2698_v41 = vpop.f32.mrb[18].mxu1  ;;  %v1328_v13 = vadd.f32 %v1265_v44, %v3706_v61  ;;  %v2824_v44 = vld [vmem:[#allocation2 + $0xe8] sm:$0xff]  }
 0x4ea   :  { %v3839_v50 = vadd.f32 %v3835_v25, %v1330_v49  ;;  %v1331_v36 = vadd.f32 %v2698_v41, %v3703_v42  ;;  %v1268_v47 = vpop.f32.mrb[19].mxu1 }
 0x4eb   :  { %v1329_v45 = vadd.f32 %v1268_v47, %v3709_v28  ;;  %v3849_v3 = vadd.f32 %v3835_v25, %v1328_v13 }
 0x4ec   :  { %v3844_v39 = vadd.f32 %v3835_v25, %v1331_v36  ;;  %1369 = vadd.xlane.f32.xlu0 %v3839_v50  ;;  %v1399_v42 = vmul.f32 %v3839_v50, %v3839_v50 }
 0x4ed   :  { %v3853_v38 = vadd.f32 %v3835_v25, %v1329_v45  ;;  %v1397_v28 = vmul.f32 %v3849_v3, %v3849_v3 }
 0x4ee   :  { %1371 = vadd.xlane.f32.xlu1 %v3844_v39  ;;  %v1400_v61 = vmul.f32 %v3844_v39, %v3844_v39 }
 0x4ef   :  { %v1398_v27 = vmul.f32 %v3853_v38, %v3853_v38 }
 0x4f0   :  { %1365 = vadd.xlane.f32.xlu0 %v3849_v3 }
 0x4f2   :  { %1367 = vadd.xlane.f32.xlu1 %v3853_v38 }
 0x4f4   :  { %1417 = vadd.xlane.f32.xlu0 %v1399_v42 }
 0x4f6   :  { %1419 = vadd.xlane.f32.xlu1 %v1400_v61 }
 0x4f7   :  { %v2701_v29 = vpop.f32.mrb[20].mxu1 }
 0x4f8   :  { %v1334_v52 = vadd.f32 %v2701_v29, %v3758_v11  ;;  %1413 = vadd.xlane.f32.xlu0 %v1397_v28  ;;  %v1281_v58 = vpop.f32.mrb[21].mxu1 }
 0x4f9   :  { %v2702_v43 = vpop.f32.mrb[22].mxu1  ;;  %v1332_v0 = vadd.f32 %v1281_v58, %v3750_v24 }
 0x4fa   :  { %v3867_v20 = vadd.f32 %v3835_v25, %v1334_v52  ;;  %v1335_v8 = vadd.f32 %v2702_v43, %v3745_v34  ;;  %1415 = vadd.xlane.f32.xlu1 %v1398_v27  ;;  %v1284_v21 = vpop.f32.mrb[23].mxu1 }
 0x4fb   :  { %v1333_v11 = vadd.f32 %v1284_v21, %v3753_v7  ;;  %v3877_v9 = vadd.f32 %v3835_v25, %v1332_v0 }
 0x4fc   :  { %v3872_v60 = vadd.f32 %v3835_v25, %v1335_v8  ;;  %1377 = vadd.xlane.f32.xlu0 %v3867_v20  ;;  %v1403_v34 = vmul.f32 %v3867_v20, %v3867_v20 }
 0x4fd   :  { %v3881_v57 = vadd.f32 %v3835_v25, %v1333_v11  ;;  %v1401_v7 = vmul.f32 %v3877_v9, %v3877_v9 }
 0x4fe   :  { %1379 = vadd.xlane.f32.xlu1 %v3872_v60  ;;  %v1404_v24 = vmul.f32 %v3872_v60, %v3872_v60 }
 0x4ff   :  { %v1402_v14 = vmul.f32 %v3881_v57, %v3881_v57 }
 0x500   :  { %1373 = vadd.xlane.f32.xlu0 %v3877_v9 }
 0x502   :  { %1375 = vadd.xlane.f32.xlu1 %v3881_v57 }
 0x504   :  { %1425 = vadd.xlane.f32.xlu0 %v1403_v34 }
 0x506   :  { %1427 = vadd.xlane.f32.xlu1 %v1404_v24 }
 0x507   :  { %v2705_v16 = vpop.f32.mrb[24].mxu1 }
 0x508   :  { %v1338_v37 = vadd.f32 %v2705_v16, %v3798_v56  ;;  %1421 = vadd.xlane.f32.xlu0 %v1401_v7  ;;  %v1297_v1 = vpop.f32.mrb[25].mxu1 }
 0x509   :  { %v2706_v35 = vpop.f32.mrb[26].mxu1  ;;  %v1336_v17 = vadd.f32 %v1297_v1, %v3792_v19  ;;  %v2821_v19 = vld [vmem:[#allocation2 + $0xd0] sm:$0xff]  }
 0x50a   :  { %v3895_v40 = vadd.f32 %v3835_v25, %v1338_v37  ;;  %v1339_v30 = vadd.f32 %v2706_v35, %v3789_v31  ;;  %1423 = vadd.xlane.f32.xlu1 %v1402_v14  ;;  %v1300_v63 = vpop.f32.mrb[27].mxu1  ;;  %2715 = vmatprep.subr.bf16.mxu0 %v2821_v19 }
 0x50b   :  { %v1337_v2 = vadd.f32 %v1300_v63, %v3795_v22  ;;  %v3905_v10 = vadd.f32 %v3835_v25, %v1336_v17  ;;  %2716 = vmatpush3.bf16.msra.mxu0 %v2821_v19 }
 0x50c   :  { %v3900_v56 = vadd.f32 %v3835_v25, %v1339_v30  ;;  %1385 = vadd.xlane.f32.xlu0 %v3895_v40  ;;  %v1407_v22 = vmul.f32 %v3895_v40, %v3895_v40  ;;  %2717 = vmatprep.subr.bf16.mxu0 %v2822_v5 }
 0x50d   :  { %v3909_v31 = vadd.f32 %v3835_v25, %v1337_v2  ;;  %v1405_v4 = vmul.f32 %v3905_v10, %v3905_v10 }
 0x50e   :  { %1387 = vadd.xlane.f32.xlu1 %v3900_v56  ;;  %v1408_v12 = vmul.f32 %v3900_v56, %v3900_v56 }
 0x50f   :  { %2718 = vmatpush3.bf16.msra.mxu0 %v2822_v5  ;;  %v1406_v54 = vmul.f32 %v3909_v31, %v3909_v31 }
 0x510   :  { %1381 = vadd.xlane.f32.xlu0 %v3905_v10  ;;  %2719 = vmatprep.subr.bf16.mxu0 %v2823_v15 }
 0x512   :  { %1383 = vadd.xlane.f32.xlu1 %v3909_v31 }
 0x513   :  { %2720 = vmatpush3.bf16.msra.mxu0 %v2823_v15 }
 0x514   :  { %1433 = vadd.xlane.f32.xlu0 %v1407_v22  ;;  %2721 = vmatprep.subr.bf16.mxu0 %v2824_v44 }
 0x516   :  { %1435 = vadd.xlane.f32.xlu1 %v1408_v12  ;;  %v2709_v26 = vpop.f32.mrb[28].mxu1 }
 0x517   :  { %v1342_v46 = vadd.f32 %v2709_v26, %v3825_v55  ;;  %v1313_v6 = vpop.f32.mrb[29].mxu1  ;;  %2722 = vmatpush3.bf16.msra.mxu0 %v2824_v44 }
 0x518   :  { %1429 = vadd.xlane.f32.xlu0 %v1405_v4  ;;  %v2710_v48 = vpop.f32.mrb[30].mxu1  ;;  %v1340_v49 = vadd.f32 %v1313_v6, %v3815_v18  ;;  %v2826_v18 = vld [vmem:[#allocation2 + $0xf8] sm:$0xff]  }
 0x519   :  { %v3923_v53 = vadd.f32 %v3835_v25, %v1342_v46  ;;  %v1343_v59 = vadd.f32 %v2710_v48, %v3828_v23  ;;  %v1316_v33 = vpop.f32.mrb[31].mxu1  ;;  %v2825_v23 = vld [vmem:[#allocation2 + $0xf0] sm:$0xff]  }
 0x51a   :  { %1431 = vadd.xlane.f32.xlu1 %v1406_v54  ;;  %v1341_v41 = vadd.f32 %v1316_v33, %v3818_v51  ;;  %v3933_v13 = vadd.f32 %v3835_v25, %v1340_v49  ;;  %2723 = vmatprep.subr.bf16.mxu0 %v2825_v23 }
 0x51b   :  { %v3928_v55 = vadd.f32 %v3835_v25, %v1343_v59  ;;  %2724 = vmatpush3.bf16.msra.mxu0 %v2825_v23 }
 0x51c   :  { %1393 = vadd.xlane.f32.xlu0 %v3923_v53  ;;  %v3937_v36 = vadd.f32 %v3835_v25, %v1341_v41  ;;  %v1409_v51 = vmul.f32 %v3933_v13, %v3933_v13  ;;  %2725 = vmatprep.subr.bf16.mxu0 %v2826_v18  ;;  %v1411_v25 = vmul.f32 %v3923_v53, %v3923_v53 }
 0x51d   :  { %v1412_v45 = vmul.f32 %v3928_v55, %v3928_v55 }
 0x51e   :  { %1395 = vadd.xlane.f32.xlu1 %v3928_v55  ;;  %v1410_v47 = vmul.f32 %v3937_v36, %v3937_v36 }
 0x51f   :  { %2726 = vmatpush3.bf16.msra.mxu0 %v2826_v18 }
 0x520   :  { %1389 = vadd.xlane.f32.xlu0 %v3933_v13 }
 0x522   :  { %1391 = vadd.xlane.f32.xlu1 %v3937_v36 }
 0x524   :  { %1437 = vadd.xlane.f32.xlu0 %v1409_v51 }
 0x526   :  { %1439 = vadd.xlane.f32.xlu1 %v1410_v47 }
 0x528   :  { %1441 = vadd.xlane.f32.xlu0 %v1411_v25 }
 0x52a   :  { %1443 = vadd.xlane.f32.xlu1 %v1412_v45 }
 0x579   :  { %v1370_v42 = vpop.xlane.xlu0 %1369 }
 0x57a   :  { %v1447_v29 = vmul.f32 0.03125, %v1370_v42 }
 0x57b   :  { %v1372_v61 = vpop.xlane.xlu1 %1371 }
 0x57c   :  { %v1448_v58 = vmul.f32 0.03125, %v1372_v61  ;;  %v1479_v43 = vmul.f32 %v1447_v29, %v1447_v29  ;;  %v1527_v42 = vsub.f32 %v3839_v50, %v1447_v29 }
 0x57d   :  { %v1366_v28 = vpop.xlane.xlu0 %1365 }
 0x57e   :  { %v3949_v0 = vmul.f32 0.03125, %v1366_v28  ;;  %v1480_v34 = vmul.f32 %v1448_v58, %v1448_v58  ;;  %v1528_v61 = vsub.f32 %v3844_v39, %v1448_v58 }
 0x57f   :  { %v1368_v52 = vpop.xlane.xlu1 %1367 }
 0x580   :  { %v3951_v21 = vmul.f32 0.03125, %v1368_v52  ;;  %v1477_v16 = vmul.f32 %v3949_v0, %v3949_v0 }
 0x581   :  { %v1418_v27 = vpop.xlane.xlu0 %1417 }
 0x582   :  { %v1463_v8 = vmul.f32 0.03125, %v1418_v27  ;;  %v1478_v35 = vmul.f32 %v3951_v21, %v3951_v21 }
 0x583   :  { %v1420_v11 = vpop.xlane.xlu1 %1419 }
 0x584   :  { %v1495_v24 = vsub.f32 %v1463_v8, %v1479_v43  ;;  %v1464_v7 = vmul.f32 0.03125, %v1420_v11 }
 0x585   :  { %v1414_v32 = vpop.xlane.xlu0 %1413 }
 0x586   :  { %v1511_v37 = vmax.f32 %v1495_v24, 0.0  ;;  %v1496_v1 = vsub.f32 %v1464_v7, %v1480_v34  ;;  %v1461_v14 = vmul.f32 0.03125, %v1414_v32  ;;  %v1525_v34 = vsub.f32 %v3849_v3, %v3949_v0 }
 0x587   :  { %v1416_v17 = vpop.xlane.xlu1 %1415 }
 0x588   :  { %v1543_v30 = vadd.f32 1e-05, %v1511_v37  ;;  %v1512_v63 = vmax.f32 %v1496_v1, 0.0  ;;  %v1493_v62 = vsub.f32 %v1461_v14, %v1477_v16  ;;  %v1462_v2 = vmul.f32 0.03125, %v1416_v17  ;;  %v3980_v1 = vld [vmem:[%s4553_s4 + $0x7] ss:$0 sm:$0xff] }
 0x589   :  { %v1378_v19 = vpop.xlane.xlu0 %1377  ;;  %v1526_v14 = vsub.f32 %v3853_v38, %v3951_v21  ;;  %v3990_v38 = vld [vmem:[%s4553_s4 + $0xb] ss:$0 sm:$0xff] }
 0x58a   :  { %2899 = vrsqrt.f32 %v1543_v30  ;;  %v1544_v22 = vadd.f32 1e-05, %v1512_v63  ;;  %v1509_v5 = vmax.f32 %v1493_v62, 0.0  ;;  %v1494_v12 = vsub.f32 %v1462_v2, %v1478_v35 }
 0x58b   :  { %v1380_v26 = vpop.xlane.xlu1 %1379  ;;  %v3957_v48 = vmul.f32 0.03125, %v1378_v19 }
 0x58c   :  { %2901 = vrsqrt.f32 %v1544_v22  ;;  %v1541_v4 = vadd.f32 1e-05, %v1509_v5  ;;  %v1510_v15 = vmax.f32 %v1494_v12, 0.0  ;;  %v3959_v59 = vmul.f32 0.03125, %v1380_v26 }
 0x58d   :  { %v1374_v46 = vpop.xlane.xlu0 %1373  ;;  %v1483_v49 = vmul.f32 %v3957_v48, %v3957_v48 }
 0x58e   :  { %2903 = vrsqrt.f32 %v1541_v4  ;;  %v1542_v6 = vadd.f32 1e-05, %v1510_v15  ;;  %v3963_v44 = vmul.f32 0.03125, %v1374_v46  ;;  %v1484_v47 = vmul.f32 %v3959_v59, %v3959_v59 }
 0x58f   :  { %v1376_v54 = vpop.xlane.xlu1 %1375 }
 0x590   :  { %2905 = vrsqrt.f32 %v1542_v6  ;;  %v3965_v23 = vmul.f32 0.03125, %v1376_v54  ;;  %v1481_v27 = vmul.f32 %v3963_v44, %v3963_v44 }
 0x591   :  { %v1426_v33 = vpop.xlane.xlu0 %1425 }
 0x592   :  { %v1467_v41 = vmul.f32 0.03125, %v1426_v33  ;;  %v1482_v32 = vmul.f32 %v3965_v23, %v3965_v23 }
 0x593   :  { %v1428_v18 = vpop.xlane.xlu1 %1427 }
 0x594   :  { %v2900_v51 = vpop.eup %2899  ;;  %v1499_v25 = vsub.f32 %v1467_v41, %v1483_v49  ;;  %v1468_v45 = vmul.f32 0.03125, %v1428_v18 }
 0x595   :  { %v1422_v28 = vpop.xlane.xlu0 %1421  ;;  %v1575_v24 = vmul.f32 %v2900_v51, %v1527_v42 }
 0x596   :  { %v2902_v52 = vpop.eup %2901  ;;  %v1515_v43 = vmax.f32 %v1499_v25, 0.0  ;;  %v1500_v8 = vsub.f32 %v1468_v45, %v1484_v47  ;;  %v1465_v11 = vmul.f32 0.03125, %v1422_v28 }
 0x597   :  { %v1576_v7 = vmul.f32 %v2902_v52, %v1528_v61  ;;  %v1424_v16 = vpop.xlane.xlu1 %1423  ;;  %v1597_v26 = vmul.f32 %v3980_v1, %v1575_v24  ;;  %v1532_v24 = vsub.f32 %v3872_v60, %v3959_v59 }
 0x598   :  { %v2904_v50 = vpop.eup %2903  ;;  %v1547_v29 = vadd.f32 1e-05, %v1515_v43  ;;  %v1516_v39 = vmax.f32 %v1500_v8, 0.0  ;;  %v1497_v58 = vsub.f32 %v1465_v11, %v1481_v27  ;;  %v1466_v37 = vmul.f32 0.03125, %v1424_v16 }
 0x599   :  { %v1386_v3 = vpop.xlane.xlu0 %1385  ;;  %v1573_v0 = vmul.f32 %v2904_v50, %v1525_v34  ;;  %v1598_v35 = vmul.f32 %v3980_v1, %v1576_v7  ;;  %v4007_v18 = vadd.f32 %v3990_v38, %v1597_v26  ;;  %v1531_v34 = vsub.f32 %v3867_v20, %v3957_v48 }
 0x59a   :  { %v2906_v17 = vpop.eup %2905  ;;  %2907 = vrsqrt.f32 %v1547_v29  ;;  %v1548_v30 = vadd.f32 1e-05, %v1516_v39  ;;  %v1513_v63 = vmax.f32 %v1497_v58, 0.0  ;;  %v1498_v62 = vsub.f32 %v1466_v37, %v1482_v32 }
 0x59b   :  { %v1388_v2 = vpop.xlane.xlu1 %1387  ;;  %v1574_v19 = vmul.f32 %v2906_v17, %v1526_v14  ;;  %v1595_v22 = vmul.f32 %v3980_v1, %v1573_v0  ;;  %v3993_v46 = vmul.f32 0.03125, %v1386_v3  ;;  %v3996_v6 = vadd.f32 %v3990_v38, %v1598_v35 }
 0x59c   :  { %2909 = vrsqrt.f32 %v1548_v30  ;;  %v1545_v5 = vadd.f32 1e-05, %v1513_v63  ;;  %v1514_v12 = vmax.f32 %v1498_v62, 0.0  ;;  %v4004_v41 = vmul.f32 0.03125, %v1388_v2 }
 0x59d   :  { %v1382_v4 = vpop.xlane.xlu0 %1381  ;;  %v1596_v21 = vmul.f32 %v3980_v1, %v1574_v19  ;;  %v3999_v33 = vadd.f32 %v3990_v38, %v1595_v22  ;;  %v1487_v25 = vmul.f32 %v3993_v46, %v3993_v46  ;;  %v1632_v61 = vpack.c.bf16 %v3996_v6, %v4007_v18 }
 0x59e   :  { %2911 = vrsqrt.f32 %v1545_v5  ;;  %v1546_v15 = vadd.f32 1e-05, %v1514_v12  ;;  %v4013_v45 = vmul.f32 0.03125, %v1382_v4  ;;  %v1488_v43 = vmul.f32 %v4004_v41, %v4004_v41 }
 0x59f   :  { %v1384_v54 = vpop.xlane.xlu1 %1383  ;;  %v4002_v49 = vadd.f32 %v3990_v38, %v1596_v21  ;;  %v1529_v58 = vsub.f32 %v3877_v9, %v3963_v44  ;;  %v1530_v17 = vsub.f32 %v3881_v57, %v3965_v23 }
 0x5a0   :  { %2913 = vrsqrt.f32 %v1546_v15  ;;  %v4017_v28 = vmul.f32 0.03125, %v1384_v54  ;;  %v1485_v16 = vmul.f32 %v4013_v45, %v4013_v45 }
 0x5a1   :  { %v1434_v51 = vpop.xlane.xlu0 %1433  ;;  %v1631_v47 = vpack.c.bf16 %v4002_v49, %v3999_v33 }
 0x5a2   :  { %v1471_v42 = vmul.f32 0.03125, %v1434_v51  ;;  %v1486_v37 = vmul.f32 %v4017_v28, %v4017_v28 }
 0x5a3   :  { %2727 = vmatprep.mubr.bf16.mxu0 %v1631_v47  ;;  %v1436_v52 = vpop.xlane.xlu1 %1435 }
 0x5a4   :  { %v2908_v27 = vpop.eup %2907  ;;  %v1503_v8 = vsub.f32 %v1471_v42, %v1487_v25  ;;  %v1472_v11 = vmul.f32 0.03125, %v1436_v52  ;;  %2728 = vmatmul.mubr.bf16.vlgmr.msra.gmra.mrb[32].mxu0 %v1632_v61 }
 0x5a5   :  { %v1430_v7 = vpop.xlane.xlu0 %1429  ;;  %v1579_v3 = vmul.f32 %v2908_v27, %v1531_v34 }
 0x5a6   :  { %v2910_v32 = vpop.eup %2909  ;;  %v1519_v50 = vmax.f32 %v1503_v8, 0.0  ;;  %v1504_v29 = vsub.f32 %v1472_v11, %v1488_v43  ;;  %v1469_v39 = vmul.f32 0.03125, %v1430_v7 }
 0x5a7   :  { %v1432_v14 = vpop.xlane.xlu1 %1431  ;;  %v1580_v20 = vmul.f32 %v2910_v32, %v1532_v24  ;;  %v1601_v21 = vmul.f32 %v3980_v1, %v1579_v3 }
 0x5a8   :  { %v2912_v48 = vpop.eup %2911  ;;  %v1551_v0 = vadd.f32 1e-05, %v1519_v50  ;;  %v1520_v60 = vmax.f32 %v1504_v29, 0.0  ;;  %v1501_v59 = vsub.f32 %v1469_v39, %v1485_v16  ;;  %v1470_v35 = vmul.f32 0.03125, %v1432_v14 }
 0x5a9   :  { %v1394_v30 = vpop.xlane.xlu0 %1393  ;;  %v1577_v63 = vmul.f32 %v2912_v48, %v1529_v58  ;;  %v1602_v62 = vmul.f32 %v3980_v1, %v1580_v20  ;;  %v4051_v52 = vadd.f32 %v3990_v38, %v1601_v21  ;;  %v1535_v58 = vsub.f32 %v3895_v40, %v3993_v46 }
 0x5aa   :  { %v2914_v2 = vpop.eup %2913  ;;  %2915 = vrsqrt.f32 %v1551_v0  ;;  %v1552_v9 = vadd.f32 1e-05, %v1520_v60  ;;  %v1517_v44 = vmax.f32 %v1501_v59, 0.0  ;;  %v1502_v19 = vsub.f32 %v1470_v35, %v1486_v37 }
 0x5ab   :  { %v1396_v22 = vpop.xlane.xlu1 %1395  ;;  %v1578_v5 = vmul.f32 %v2914_v2, %v1530_v17  ;;  %v1599_v12 = vmul.f32 %v3980_v1, %v1577_v63  ;;  %v4038_v54 = vadd.f32 %v3990_v38, %v1602_v62  ;;  %v4055_v8 = vmul.f32 0.03125, %v1394_v30 }
 0x5ac   :  { %2917 = vrsqrt.f32 %v1552_v9  ;;  %v1549_v26 = vadd.f32 1e-05, %v1517_v44  ;;  %v1518_v4 = vmax.f32 %v1502_v19, 0.0  ;;  %v4061_v7 = vmul.f32 0.03125, %v1396_v22 }
 0x5ad   :  { %v1390_v15 = vpop.xlane.xlu0 %1389  ;;  %v1600_v57 = vmul.f32 %v3980_v1, %v1578_v5  ;;  %v4043_v25 = vadd.f32 %v3990_v38, %v1599_v12  ;;  %v1634_v24 = vpack.c.bf16 %v4038_v54, %v4051_v52  ;;  %v1536_v37 = vsub.f32 %v3900_v56, %v4004_v41 }
 0x5ae   :  { %2919 = vrsqrt.f32 %v1549_v26  ;;  %v1550_v23 = vadd.f32 1e-05, %v1518_v4  ;;  %v4040_v51 = vmul.f32 0.03125, %v1390_v15  ;;  %v1491_v20 = vmul.f32 %v4055_v8, %v4055_v8 }
 0x5af   :  { %v1392_v47 = vpop.xlane.xlu1 %1391  ;;  %v4046_v42 = vadd.f32 %v3990_v38, %v1600_v57  ;;  %v1533_v59 = vsub.f32 %v3905_v10, %v4013_v45  ;;  %v1492_v35 = vmul.f32 %v4061_v7, %v4061_v7  ;;  %v1534_v2 = vsub.f32 %v3909_v31, %v4017_v28 }
 0x5b0   :  { %2921 = vrsqrt.f32 %v1550_v23  ;;  %v4048_v61 = vmul.f32 0.03125, %v1392_v47  ;;  %v1489_v11 = vmul.f32 %v4040_v51, %v4040_v51 }
 0x5b1   :  { %v1438_v27 = vpop.xlane.xlu0 %1437  ;;  %v1633_v43 = vpack.c.bf16 %v4046_v42, %v4043_v25 }
 0x5b2   :  { %v1473_v34 = vmul.f32 0.03125, %v1438_v27  ;;  %v1490_v50 = vmul.f32 %v4048_v61, %v4048_v61 }
 0x5b3   :  { %2731 = vmatprep.mubr.bf16.mxu0 %v1633_v43  ;;  %v1440_v32 = vpop.xlane.xlu1 %1439 }
 0x5b4   :  { %v2916_v16 = vpop.eup %2915  ;;  %v1505_v29 = vsub.f32 %v1473_v34, %v1489_v11  ;;  %v1474_v39 = vmul.f32 0.03125, %v1440_v32  ;;  %2732 = vmatmul.mubr.bf16.gmra.mrb[36].mxu0 %v1634_v24  ;;  %v1537_v11 = vsub.f32 %v3933_v13, %v4040_v51  ;;  %v1538_v24 = vsub.f32 %v3937_v36, %v4048_v61 }
 0x5b5   :  { %v1442_v14 = vpop.xlane.xlu0 %1441  ;;  %v1583_v30 = vmul.f32 %v2916_v16, %v1535_v58 }
 0x5b6   :  { %v2918_v3 = vpop.eup %2917  ;;  %v1521_v48 = vmax.f32 %v1505_v29, 0.0  ;;  %v1506_v0 = vsub.f32 %v1474_v39, %v1490_v50  ;;  %v1475_v60 = vmul.f32 0.03125, %v1442_v14  ;;  %v1539_v50 = vsub.f32 %v3923_v53, %v4055_v8 }
 0x5b7   :  { %v1444_v17 = vpop.xlane.xlu1 %1443  ;;  %v1584_v40 = vmul.f32 %v2918_v3, %v1536_v37  ;;  %v1605_v21 = vmul.f32 %v3980_v1, %v1583_v30  ;;  %v1540_v37 = vsub.f32 %v3928_v55, %v4061_v7 }
 0x5b8   :  { %v2920_v46 = vpop.eup %2919  ;;  %v1553_v63 = vadd.f32 1e-05, %v1521_v48  ;;  %v1522_v56 = vmax.f32 %v1506_v0, 0.0  ;;  %v1507_v41 = vsub.f32 %v1475_v60, %v1491_v20  ;;  %v1476_v62 = vmul.f32 0.03125, %v1444_v17  ;;  %v4128_v60 = vld [vmem:[%s4553_s4 + $0x4] ss:$0 sm:$0xff] }
 0x5b9   :  { %v1581_v9 = vmul.f32 %v2920_v46, %v1533_v59  ;;  %v1606_v44 = vmul.f32 %v3980_v1, %v1584_v40  ;;  %v4091_v47 = vadd.f32 %v3990_v38, %v1605_v21 }
 0x5ba   :  { %v2922_v19 = vpop.eup %2921  ;;  %2923 = vrsqrt.f32 %v1553_v63  ;;  %v1554_v10 = vadd.f32 1e-05, %v1522_v56  ;;  %v1523_v45 = vmax.f32 %v1507_v41, 0.0  ;;  %v1508_v22 = vsub.f32 %v1476_v62, %v1492_v35 }
 0x5bb   :  { %v1582_v5 = vmul.f32 %v2922_v19, %v1534_v2  ;;  %v1603_v12 = vmul.f32 %v3980_v1, %v1581_v9  ;;  %v4082_v28 = vadd.f32 %v3990_v38, %v1606_v44 }
 0x5bc   :  { %2925 = vrsqrt.f32 %v1554_v10  ;;  %v1555_v26 = vadd.f32 1e-05, %v1523_v45  ;;  %v1524_v4 = vmax.f32 %v1508_v22, 0.0 }
 0x5bd   :  { %v1604_v15 = vmul.f32 %v3980_v1, %v1582_v5  ;;  %v4085_v57 = vadd.f32 %v3990_v38, %v1603_v12  ;;  %v1636_v43 = vpack.c.bf16 %v4082_v28, %v4091_v47 }
 0x5be   :  { %2927 = vrsqrt.f32 %v1555_v26  ;;  %v1556_v31 = vadd.f32 1e-05, %v1524_v4  ;;  %v2827_v4 = vld [vmem:[%s4552_s3] sm:$0xff]  }
 0x5bf   :  { %v4088_v23 = vadd.f32 %v3990_v38, %v1604_v15  ;;  %2743 = vmatprep.subr.bf16.mxu0 %v2827_v4  ;;  %2775 = vmatprep.subr.bf16.mxu1 %v2827_v4 }
 0x5c0   :  { %2929 = vrsqrt.f32 %v1556_v31  ;;  %2744 = vmatpush3.bf16.msra.mxu0 %v2827_v4  ;;  %2783 = vmatpush3.bf16.msra.mxu1 %v2827_v4 }
 0x5c1   :  { %v1635_v27 = vpack.c.bf16 %v4088_v23, %v4085_v57 }
 0x5c3   :  { %2735 = vmatprep.mubr.bf16.mxu0 %v1635_v27 }
 0x5c4   :  { %v2924_v34 = vpop.eup %2923  ;;  %2736 = vmatmul.mubr.bf16.gmra.mrb[40].mxu0 %v1636_v43 }
 0x5c5   :  { %v1585_v32 = vmul.f32 %v2924_v34, %v1537_v11 }
 0x5c6   :  { %v2926_v16 = vpop.eup %2925 }
 0x5c7   :  { %v1586_v29 = vmul.f32 %v2926_v16, %v1538_v24  ;;  %v1607_v39 = vmul.f32 %v3980_v1, %v1585_v32 }
 0x5c8   :  { %v2928_v58 = vpop.eup %2927 }
 0x5c9   :  { %v1608_v13 = vmul.f32 %v3980_v1, %v1586_v29  ;;  %v1587_v51 = vmul.f32 %v2928_v58, %v1539_v50  ;;  %v4108_v3 = vadd.f32 %v3990_v38, %v1607_v39  ;;  %v2830_v39 = vld [vmem:[%s4552_s3 + $0x18] sm:$0xff]  }
 0x5ca   :  { %v2930_v14 = vpop.eup %2929 }
 0x5cb   :  { %v4111_v36 = vadd.f32 %v3990_v38, %v1608_v13  ;;  %v1588_v61 = vmul.f32 %v2930_v14, %v1540_v37  ;;  %v1609_v53 = vmul.f32 %v3980_v1, %v1587_v51  ;;  %v2831_v51 = vld [vmem:[%s4552_s3 + $0x20] sm:$0xff]  }
 0x5cd   :  { %v1637_v8 = vpack.c.bf16 %v4111_v36, %v4108_v3  ;;  %v1610_v20 = vmul.f32 %v3980_v1, %v1588_v61  ;;  %v4118_v55 = vadd.f32 %v3990_v38, %v1609_v53 }
 0x5cf   :  { %2739 = vmatprep.mubr.bf16.mxu0 %v1637_v8  ;;  %v4121_v7 = vadd.f32 %v3990_v38, %v1610_v20 }
 0x5d1   :  { %v1638_v48 = vpack.c.bf16 %v4121_v7, %v4118_v55 }
 0x5d3   :  { %2740 = vmatmul.mubr.bf16.gmra.mrb[44].mxu0 %v1638_v48 }
 0x677   :  { %v2729_v0 = vpop.f32.mrb[32].mxu0 }
 0x678   :  { %v1803_v59 = vadd.f32 %v2729_v0, %v4007_v18  ;;  %v1738_v1 = vpop.f32.mrb[33].mxu0 }
 0x679   :  { %v2730_v35 = vpop.f32.mrb[34].mxu0  ;;  %v1801_v38 = vadd.f32 %v1738_v1, %v3999_v33 }
 0x67a   :  { %v4132_v17 = vadd.f32 %v4128_v60, %v1803_v59  ;;  %v1804_v30 = vadd.f32 %v2730_v35, %v3996_v6  ;;  %v1741_v40 = vpop.f32.mrb[35].mxu0 }
 0x67b   :  { %v1802_v63 = vadd.f32 %v1741_v40, %v4002_v49  ;;  %v4142_v56 = vadd.f32 %v4128_v60, %v1801_v38 }
 0x67c   :  { %v4137_v46 = vadd.f32 %v4128_v60, %v1804_v30  ;;  %1842 = vadd.xlane.f32.xlu0 %v4132_v17  ;;  %v1872_v6 = vmul.f32 %v4132_v17, %v4132_v17  ;;  %v2834_v30 = vld [vmem:[%s4552_s3 + $0x38] sm:$0xff]  }
 0x67d   :  { %v4146_v18 = vadd.f32 %v4128_v60, %v1802_v63  ;;  %v1870_v49 = vmul.f32 %v4142_v56, %v4142_v56 }
 0x67e   :  { %1844 = vadd.xlane.f32.xlu1 %v4137_v46  ;;  %v1873_v33 = vmul.f32 %v4137_v46, %v4137_v46 }
 0x67f   :  { %v1871_v9 = vmul.f32 %v4146_v18, %v4146_v18 }
 0x680   :  { %1838 = vadd.xlane.f32.xlu0 %v4142_v56 }
 0x682   :  { %1840 = vadd.xlane.f32.xlu1 %v4146_v18 }
 0x684   :  { %1890 = vadd.xlane.f32.xlu0 %v1872_v6 }
 0x686   :  { %1892 = vadd.xlane.f32.xlu1 %v1873_v33 }
 0x687   :  { %v2733_v41 = vpop.f32.mrb[36].mxu0 }
 0x688   :  { %v1807_v62 = vadd.f32 %v2733_v41, %v4051_v52  ;;  %1886 = vadd.xlane.f32.xlu0 %v1870_v49  ;;  %v1754_v2 = vpop.f32.mrb[37].mxu0 }
 0x689   :  { %v2734_v44 = vpop.f32.mrb[38].mxu0  ;;  %v1805_v10 = vadd.f32 %v1754_v2, %v4043_v25 }
 0x68a   :  { %v4160_v19 = vadd.f32 %v4128_v60, %v1807_v62  ;;  %v1808_v45 = vadd.f32 %v2734_v44, %v4038_v54  ;;  %1888 = vadd.xlane.f32.xlu1 %v1871_v9  ;;  %v1757_v22 = vpop.f32.mrb[39].mxu0 }
 0x68b   :  { %v1806_v52 = vadd.f32 %v1757_v22, %v4046_v42  ;;  %v4170_v12 = vadd.f32 %v4128_v60, %v1805_v10 }
 0x68c   :  { %v4165_v5 = vadd.f32 %v4128_v60, %v1808_v45  ;;  %1850 = vadd.xlane.f32.xlu0 %v4160_v19  ;;  %v1876_v54 = vmul.f32 %v4160_v19, %v4160_v19 }
 0x68d   :  { %v4174_v26 = vadd.f32 %v4128_v60, %v1806_v52  ;;  %v1874_v42 = vmul.f32 %v4170_v12, %v4170_v12 }
 0x68e   :  { %1852 = vadd.xlane.f32.xlu1 %v4165_v5  ;;  %v1877_v25 = vmul.f32 %v4165_v5, %v4165_v5 }
 0x68f   :  { %v1875_v27 = vmul.f32 %v4174_v26, %v4174_v26 }
 0x690   :  { %1846 = vadd.xlane.f32.xlu0 %v4170_v12 }
 0x692   :  { %1848 = vadd.xlane.f32.xlu1 %v4174_v26 }
 0x694   :  { %1898 = vadd.xlane.f32.xlu0 %v1876_v54 }
 0x696   :  { %1900 = vadd.xlane.f32.xlu1 %v1877_v25 }
 0x697   :  { %v2737_v21 = vpop.f32.mrb[40].mxu0 }
 0x698   :  { %v1811_v15 = vadd.f32 %v2737_v21, %v4091_v47  ;;  %1894 = vadd.xlane.f32.xlu0 %v1874_v42  ;;  %v1770_v31 = vpop.f32.mrb[41].mxu0  ;;  %v2828_v47 = vld [vmem:[%s4552_s3 + $0x8] sm:$0xff]  }
 0x699   :  { %v2738_v43 = vpop.f32.mrb[42].mxu0  ;;  %v1809_v34 = vadd.f32 %v1770_v31, %v4085_v57  ;;  %2745 = vmatprep.subr.bf16.mxu0 %v2828_v47  ;;  %2776 = vmatprep.subr.bf16.mxu1 %v2828_v47 }
 0x69a   :  { %v4191_v11 = vadd.f32 %v4128_v60, %v1811_v15  ;;  %v1812_v24 = vadd.f32 %v2738_v43, %v4082_v28  ;;  %1896 = vadd.xlane.f32.xlu1 %v1875_v27  ;;  %v1773_v32 = vpop.f32.mrb[43].mxu0  ;;  %2746 = vmatpush3.bf16.msra.mxu0 %v2828_v47  ;;  %v2829_v28 = vld [vmem:[%s4552_s3 + $0x10] sm:$0xff]  }
 0x69b   :  { %v1810_v50 = vadd.f32 %v1773_v32, %v4088_v23  ;;  %v4204_v57 = vadd.f32 %v4128_v60, %v1809_v34  ;;  %2784 = vmatpush3.bf16.msra.mxu1 %v2828_v47  ;;  %2747 = vmatprep.subr.bf16.mxu0 %v2829_v28 }
 0x69c   :  { %v4199_v16 = vadd.f32 %v4128_v60, %v1812_v24  ;;  %1858 = vadd.xlane.f32.xlu0 %v4191_v11  ;;  %2777 = vmatprep.subr.bf16.mxu1 %v2829_v28  ;;  %v1880_v23 = vmul.f32 %v4191_v11, %v4191_v11 }
 0x69d   :  { %v4211_v29 = vadd.f32 %v4128_v60, %v1810_v50  ;;  %v1878_v13 = vmul.f32 %v4204_v57, %v4204_v57 }
 0x69e   :  { %1860 = vadd.xlane.f32.xlu1 %v4199_v16  ;;  %2748 = vmatpush3.bf16.msra.mxu0 %v2829_v28  ;;  %v1881_v58 = vmul.f32 %v4199_v16, %v4199_v16 }
 0x69f   :  { %2785 = vmatpush3.bf16.msra.mxu1 %v2829_v28  ;;  %2749 = vmatprep.subr.bf16.mxu0 %v2830_v39  ;;  %v1879_v8 = vmul.f32 %v4211_v29, %v4211_v29 }
 0x6a0   :  { %1854 = vadd.xlane.f32.xlu0 %v4204_v57  ;;  %2778 = vmatprep.subr.bf16.mxu1 %v2830_v39 }
 0x6a2   :  { %1856 = vadd.xlane.f32.xlu1 %v4211_v29  ;;  %2750 = vmatpush3.bf16.msra.mxu0 %v2830_v39 }
 0x6a3   :  { %2786 = vmatpush3.bf16.msra.mxu1 %v2830_v39  ;;  %2751 = vmatprep.subr.bf16.mxu0 %v2831_v51 }
 0x6a4   :  { %1906 = vadd.xlane.f32.xlu0 %v1880_v23  ;;  %2779 = vmatprep.subr.bf16.mxu1 %v2831_v51 }
 0x6a6   :  { %1908 = vadd.xlane.f32.xlu1 %v1881_v58  ;;  %v2741_v37 = vpop.f32.mrb[44].mxu0  ;;  %2752 = vmatpush3.bf16.msra.mxu0 %v2831_v51 }
 0x6a7   :  { %v1815_v14 = vadd.f32 %v2741_v37, %v4118_v55  ;;  %v1786_v61 = vpop.f32.mrb[45].mxu0  ;;  %v2832_v55 = vld [vmem:[%s4552_s3 + $0x28] sm:$0xff]   ;;  %2787 = vmatpush3.bf16.msra.mxu1 %v2831_v51 }
 0x6a8   :  { %1902 = vadd.xlane.f32.xlu0 %v1878_v13  ;;  %v2742_v53 = vpop.f32.mrb[46].mxu0  ;;  %v1813_v59 = vadd.f32 %v1786_v61, %v4108_v3  ;;  %2753 = vmatprep.subr.bf16.mxu0 %v2832_v55  ;;  %v2833_v3 = vld [vmem:[%s4552_s3 + $0x30] sm:$0xff]  }
 0x6a9   :  { %v4231_v20 = vadd.f32 %v4128_v60, %v1815_v14  ;;  %v1816_v48 = vadd.f32 %v2742_v53, %v4121_v7  ;;  %v1789_v0 = vpop.f32.mrb[47].mxu0  ;;  %2780 = vmatprep.subr.bf16.mxu1 %v2832_v55 }
 0x6aa   :  { %1904 = vadd.xlane.f32.xlu1 %v1879_v8  ;;  %v1814_v35 = vadd.f32 %v1789_v0, %v4111_v36  ;;  %2754 = vmatpush3.bf16.msra.mxu0 %v2832_v55  ;;  %v4244_v7 = vadd.f32 %v4128_v60, %v1813_v59 }
 0x6ab   :  { %v4239_v1 = vadd.f32 %v4128_v60, %v1816_v48  ;;  %2788 = vmatpush3.bf16.msra.mxu1 %v2832_v55  ;;  %2755 = vmatprep.subr.bf16.mxu0 %v2833_v3  ;;  %v1884_v40 = vmul.f32 %v4231_v20, %v4231_v20 }
 0x6ac   :  { %1866 = vadd.xlane.f32.xlu0 %v4231_v20  ;;  %v4251_v38 = vadd.f32 %v4128_v60, %v1814_v35  ;;  %2781 = vmatprep.subr.bf16.mxu1 %v2833_v3  ;;  %v1882_v36 = vmul.f32 %v4244_v7, %v4244_v7 }
 0x6ad   :  { %v1885_v63 = vmul.f32 %v4239_v1, %v4239_v1 }
 0x6ae   :  { %1868 = vadd.xlane.f32.xlu1 %v4239_v1  ;;  %2756 = vmatpush3.bf16.msra.mxu0 %v2833_v3  ;;  %v1883_v60 = vmul.f32 %v4251_v38, %v4251_v38 }
 0x6af   :  { %2789 = vmatpush3.bf16.msra.mxu1 %v2833_v3  ;;  %2757 = vmatprep.subr.bf16.mxu0 %v2834_v30 }
 0x6b0   :  { %1862 = vadd.xlane.f32.xlu0 %v4244_v7  ;;  %2782 = vmatprep.subr.bf16.mxu1 %v2834_v30 }
 0x6b2   :  { %1864 = vadd.xlane.f32.xlu1 %v4251_v38  ;;  %2758 = vmatpush3.bf16.msra.mxu0 %v2834_v30 }
 0x6b3   :  { %2790 = vmatpush3.bf16.msra.mxu1 %v2834_v30 }
 0x6b4   :  { %1910 = vadd.xlane.f32.xlu0 %v1882_v36 }
 0x6b6   :  { %1912 = vadd.xlane.f32.xlu1 %v1883_v60 }
 0x6b8   :  { %1914 = vadd.xlane.f32.xlu0 %v1884_v40 }
 0x6ba   :  { %1916 = vadd.xlane.f32.xlu1 %v1885_v63 }
 0x709   :  { %v1843_v6 = vpop.xlane.xlu0 %1842 }
 0x70a   :  { %v1920_v41 = vmul.f32 0.03125, %v1843_v6 }
 0x70b   :  { %v1845_v33 = vpop.xlane.xlu1 %1844 }
 0x70c   :  { %v1921_v2 = vmul.f32 0.03125, %v1845_v33  ;;  %v1952_v44 = vmul.f32 %v1920_v41, %v1920_v41  ;;  %v2000_v6 = vsub.f32 %v4132_v17, %v1920_v41 }
 0x70d   :  { %v1839_v49 = vpop.xlane.xlu0 %1838 }
 0x70e   :  { %v4266_v10 = vmul.f32 0.03125, %v1839_v49  ;;  %v1953_v54 = vmul.f32 %v1921_v2, %v1921_v2  ;;  %v2001_v33 = vsub.f32 %v4137_v46, %v1921_v2 }
 0x70f   :  { %v1841_v62 = vpop.xlane.xlu1 %1840 }
 0x710   :  { %v4268_v22 = vmul.f32 0.03125, %v1841_v62  ;;  %v1950_v21 = vmul.f32 %v4266_v10, %v4266_v10 }
 0x711   :  { %v1891_v9 = vpop.xlane.xlu0 %1890 }
 0x712   :  { %v1936_v45 = vmul.f32 0.03125, %v1891_v9  ;;  %v1951_v43 = vmul.f32 %v4268_v22, %v4268_v22 }
 0x713   :  { %v1893_v52 = vpop.xlane.xlu1 %1892 }
 0x714   :  { %v1968_v25 = vsub.f32 %v1936_v45, %v1952_v44  ;;  %v1937_v42 = vmul.f32 0.03125, %v1893_v52 }
 0x715   :  { %v1887_v4 = vpop.xlane.xlu0 %1886 }
 0x716   :  { %v1984_v15 = vmax.f32 %v1968_v25, 0.0  ;;  %v1969_v31 = vsub.f32 %v1937_v42, %v1953_v54  ;;  %v1934_v27 = vmul.f32 0.03125, %v1887_v4  ;;  %v1998_v54 = vsub.f32 %v4142_v56, %v4266_v10 }
 0x717   :  { %v1889_v34 = vpop.xlane.xlu1 %1888 }
 0x718   :  { %v2016_v24 = vadd.f32 1e-05, %v1984_v15  ;;  %v1985_v32 = vmax.f32 %v1969_v31, 0.0  ;;  %v1966_v47 = vsub.f32 %v1934_v27, %v1950_v21  ;;  %v1935_v50 = vmul.f32 0.03125, %v1889_v34  ;;  %v4297_v31 = vld [vmem:[%s4553_s4 + $0x8] ss:$0 sm:$0xff] }
 0x719   :  { %v1851_v28 = vpop.xlane.xlu0 %1850  ;;  %v1999_v27 = vsub.f32 %v4146_v18, %v4268_v22  ;;  %v4307_v18 = vld [vmem:[%s4553_s4 + $0xc] ss:$0 sm:$0xff] }
 0x71a   :  { %2931 = vrsqrt.f32 %v2016_v24  ;;  %v2017_v23 = vadd.f32 1e-05, %v1985_v32  ;;  %v1982_v39 = vmax.f32 %v1966_v47, 0.0  ;;  %v1967_v58 = vsub.f32 %v1935_v50, %v1951_v43 }
 0x71b   :  { %v1853_v37 = vpop.xlane.xlu1 %1852  ;;  %v4274_v53 = vmul.f32 0.03125, %v1851_v28 }
 0x71c   :  { %2933 = vrsqrt.f32 %v2017_v23  ;;  %v2014_v13 = vadd.f32 1e-05, %v1982_v39  ;;  %v1983_v51 = vmax.f32 %v1967_v58, 0.0  ;;  %v4276_v48 = vmul.f32 0.03125, %v1853_v37 }
 0x71d   :  { %v1847_v14 = vpop.xlane.xlu0 %1846  ;;  %v1956_v59 = vmul.f32 %v4274_v53, %v4274_v53 }
 0x71e   :  { %2935 = vrsqrt.f32 %v2014_v13  ;;  %v2015_v61 = vadd.f32 1e-05, %v1983_v51  ;;  %v4280_v55 = vmul.f32 0.03125, %v1847_v14  ;;  %v1957_v60 = vmul.f32 %v4276_v48, %v4276_v48 }
 0x71f   :  { %v1849_v8 = vpop.xlane.xlu1 %1848 }
 0x720   :  { %2937 = vrsqrt.f32 %v2015_v61  ;;  %v4282_v3 = vmul.f32 0.03125, %v1849_v8  ;;  %v1954_v9 = vmul.f32 %v4280_v55, %v4280_v55 }
 0x721   :  { %v1899_v0 = vpop.xlane.xlu0 %1898 }
 0x722   :  { %v1940_v35 = vmul.f32 0.03125, %v1899_v0  ;;  %v1955_v4 = vmul.f32 %v4282_v3, %v4282_v3 }
 0x723   :  { %v1901_v36 = vpop.xlane.xlu1 %1900 }
 0x724   :  { %v2932_v30 = vpop.eup %2931  ;;  %v1972_v40 = vsub.f32 %v1940_v35, %v1956_v59  ;;  %v1941_v63 = vmul.f32 0.03125, %v1901_v36 }
 0x725   :  { %v1895_v49 = vpop.xlane.xlu0 %1894  ;;  %v2048_v25 = vmul.f32 %v2932_v30, %v2000_v6 }
 0x726   :  { %v2934_v62 = vpop.eup %2933  ;;  %v1988_v44 = vmax.f32 %v1972_v40, 0.0  ;;  %v1973_v45 = vsub.f32 %v1941_v63, %v1957_v60  ;;  %v1938_v52 = vmul.f32 0.03125, %v1895_v49 }
 0x727   :  { %v2049_v42 = vmul.f32 %v2934_v62, %v2001_v33  ;;  %v1897_v21 = vpop.xlane.xlu1 %1896  ;;  %v2070_v37 = vmul.f32 %v4297_v31, %v2048_v25  ;;  %v2005_v25 = vsub.f32 %v4165_v5, %v4276_v48 }
 0x728   :  { %v2936_v17 = vpop.eup %2935  ;;  %v2020_v41 = vadd.f32 1e-05, %v1988_v44  ;;  %v1989_v46 = vmax.f32 %v1973_v45, 0.0  ;;  %v1970_v2 = vsub.f32 %v1938_v52, %v1954_v9  ;;  %v1939_v15 = vmul.f32 0.03125, %v1897_v21 }
 0x729   :  { %v1859_v56 = vpop.xlane.xlu0 %1858  ;;  %v2046_v10 = vmul.f32 %v2936_v17, %v1998_v54  ;;  %v2071_v43 = vmul.f32 %v4297_v31, %v2049_v42  ;;  %v2090_v36 = vadd.f32 %v4307_v18, %v2070_v37  ;;  %v2004_v54 = vsub.f32 %v4160_v19, %v4274_v53 }
 0x72a   :  { %v2938_v34 = vpop.eup %2937  ;;  %2939 = vrsqrt.f32 %v2020_v41  ;;  %v2021_v24 = vadd.f32 1e-05, %v1989_v46  ;;  %v1986_v32 = vmax.f32 %v1970_v2, 0.0  ;;  %v1971_v47 = vsub.f32 %v1939_v15, %v1955_v4 }
 0x72b   :  { %v1861_v50 = vpop.xlane.xlu1 %1860  ;;  %v2047_v28 = vmul.f32 %v2938_v34, %v1999_v27  ;;  %v2068_v23 = vmul.f32 %v4297_v31, %v2046_v10  ;;  %v4310_v14 = vmul.f32 0.03125, %v1859_v56  ;;  %v2091_v61 = vadd.f32 %v4307_v18, %v2071_v43 }
 0x72c   :  { %2941 = vrsqrt.f32 %v2021_v24  ;;  %v2018_v39 = vadd.f32 1e-05, %v1986_v32  ;;  %v1987_v58 = vmax.f32 %v1971_v47, 0.0  ;;  %v4315_v35 = vmul.f32 0.03125, %v1861_v50 }
 0x72d   :  { %v1855_v13 = vpop.xlane.xlu0 %1854  ;;  %v2069_v22 = vmul.f32 %v4297_v31, %v2047_v28  ;;  %v2088_v0 = vadd.f32 %v4307_v18, %v2068_v23  ;;  %v1960_v40 = vmul.f32 %v4310_v14, %v4310_v14  ;;  %v2105_v33 = vpack.c.bf16 %v2091_v61, %v2090_v36 }
 0x72e   :  { %2943 = vrsqrt.f32 %v2018_v39  ;;  %v2019_v51 = vadd.f32 1e-05, %v1987_v58  ;;  %v4320_v63 = vmul.f32 0.03125, %v1855_v13  ;;  %v1961_v44 = vmul.f32 %v4315_v35, %v4315_v35 }
 0x72f   :  { %v1857_v8 = vpop.xlane.xlu1 %1856  ;;  %v2089_v59 = vadd.f32 %v4307_v18, %v2069_v22  ;;  %v2002_v2 = vsub.f32 %v4170_v12, %v4280_v55  ;;  %v2003_v34 = vsub.f32 %v4174_v26, %v4282_v3 }
 0x730   :  { %2945 = vrsqrt.f32 %v2019_v51  ;;  %v4322_v49 = vmul.f32 0.03125, %v1857_v8  ;;  %v1958_v21 = vmul.f32 %v4320_v63, %v4320_v63 }
 0x731   :  { %v1907_v30 = vpop.xlane.xlu0 %1906  ;;  %v2104_v60 = vpack.c.bf16 %v2089_v59, %v2088_v0 }
 0x732   :  { %v1944_v6 = vmul.f32 0.03125, %v1907_v30  ;;  %v1959_v56 = vmul.f32 %v4322_v49, %v4322_v49 }
 0x733   :  { %2759 = vmatprep.mubr.bf16.mxu0 %v2104_v60  ;;  %v1909_v62 = vpop.xlane.xlu1 %1908 }
 0x734   :  { %v2940_v9 = vpop.eup %2939  ;;  %v1976_v45 = vsub.f32 %v1944_v6, %v1960_v40  ;;  %v1945_v52 = vmul.f32 0.03125, %v1909_v62  ;;  %2760 = vmatmul.mubr.bf16.vlgmr.msra.gmra.mrb[48].mxu0 %v2105_v33 }
 0x735   :  { %v1903_v42 = vpop.xlane.xlu0 %1902  ;;  %v2052_v15 = vmul.f32 %v2940_v9, %v2004_v54 }
 0x736   :  { %v2942_v4 = vpop.eup %2941  ;;  %v1992_v17 = vmax.f32 %v1976_v45, 0.0  ;;  %v1977_v41 = vsub.f32 %v1945_v52, %v1961_v44  ;;  %v1942_v46 = vmul.f32 0.03125, %v1903_v42 }
 0x737   :  { %v2053_v27 = vmul.f32 %v2942_v4, %v2005_v25  ;;  %v1905_v19 = vpop.xlane.xlu1 %1904  ;;  %v2074_v22 = vmul.f32 %v4297_v31, %v2052_v15 }
 0x738   :  { %v2944_v53 = vpop.eup %2943  ;;  %v2024_v10 = vadd.f32 1e-05, %v1992_v17  ;;  %v1993_v5 = vmax.f32 %v1977_v41, 0.0  ;;  %v1974_v48 = vsub.f32 %v1942_v46, %v1958_v21  ;;  %v1943_v43 = vmul.f32 0.03125, %v1905_v19 }
 0x739   :  { %v1867_v24 = vpop.xlane.xlu0 %1866  ;;  %v2050_v32 = vmul.f32 %v2944_v53, %v2002_v2  ;;  %v2075_v47 = vmul.f32 %v4297_v31, %v2053_v27  ;;  %v2094_v60 = vadd.f32 %v4307_v18, %v2074_v22  ;;  %v2008_v21 = vsub.f32 %v4191_v11, %v4310_v14 }
 0x73a   :  { %v2946_v50 = vpop.eup %2945  ;;  %2947 = vrsqrt.f32 %v2024_v10  ;;  %v2025_v12 = vadd.f32 1e-05, %v1993_v5  ;;  %v1990_v55 = vmax.f32 %v1974_v48, 0.0  ;;  %v1975_v28 = vsub.f32 %v1943_v43, %v1959_v56 }
 0x73b   :  { %v1869_v23 = vpop.xlane.xlu1 %1868  ;;  %v2051_v39 = vmul.f32 %v2946_v50, %v2003_v34  ;;  %v2072_v58 = vmul.f32 %v4297_v31, %v2050_v32  ;;  %v2095_v61 = vadd.f32 %v4307_v18, %v2075_v47  ;;  %v4350_v33 = vmul.f32 0.03125, %v1867_v24 }
 0x73c   :  { %2949 = vrsqrt.f32 %v2025_v12  ;;  %v2022_v37 = vadd.f32 1e-05, %v1990_v55  ;;  %v1991_v13 = vmax.f32 %v1975_v28, 0.0  ;;  %v4354_v45 = vmul.f32 0.03125, %v1869_v23 }
 0x73d   :  { %v1863_v51 = vpop.xlane.xlu0 %1862  ;;  %v2073_v26 = vmul.f32 %v4297_v31, %v2051_v39  ;;  %v2092_v59 = vadd.f32 %v4307_v18, %v2072_v58  ;;  %v2107_v44 = vpack.c.bf16 %v2095_v61, %v2094_v60  ;;  %v2009_v17 = vsub.f32 %v4199_v16, %v4315_v35 }
 0x73e   :  { %2951 = vrsqrt.f32 %v2022_v37  ;;  %v2023_v3 = vadd.f32 1e-05, %v1991_v13  ;;  %v4343_v8 = vmul.f32 0.03125, %v1863_v51  ;;  %v1964_v2 = vmul.f32 %v4350_v33, %v4350_v33 }
 0x73f   :  { %v1865_v0 = vpop.xlane.xlu1 %1864  ;;  %v2093_v36 = vadd.f32 %v4307_v18, %v2073_v26  ;;  %v2006_v19 = vsub.f32 %v4204_v57, %v4320_v63  ;;  %v1965_v53 = vmul.f32 %v4354_v45, %v4354_v45  ;;  %v2007_v34 = vsub.f32 %v4211_v29, %v4322_v49 }
 0x740   :  { %2953 = vrsqrt.f32 %v2023_v3  ;;  %v4347_v30 = vmul.f32 0.03125, %v1865_v0  ;;  %v1962_v62 = vmul.f32 %v4343_v8, %v4343_v8  ;;  %v2010_v3 = vsub.f32 %v4244_v7, %v4343_v8 }
 0x741   :  { %v1911_v40 = vpop.xlane.xlu0 %1910  ;;  %v2106_v6 = vpack.c.bf16 %v2093_v36, %v2092_v59  ;;  %v2012_v60 = vsub.f32 %v4231_v20, %v4350_v33 }
 0x742   :  { %v1946_v9 = vmul.f32 0.03125, %v1911_v40  ;;  %v1963_v25 = vmul.f32 %v4347_v30, %v4347_v30  ;;  %v2011_v0 = vsub.f32 %v4251_v38, %v4347_v30 }
 0x743   :  { %2763 = vmatprep.mubr.bf16.mxu1 %v2106_v6  ;;  %v1913_v52 = vpop.xlane.xlu1 %1912 }
 0x744   :  { %v2948_v54 = vpop.eup %2947  ;;  %v1978_v42 = vsub.f32 %v1946_v9, %v1962_v62  ;;  %v1947_v4 = vmul.f32 0.03125, %v1913_v52  ;;  %2764 = vmatmul.mubr.bf16.vlgmr.msra.gmra.mrb[32].mxu1 %v2107_v44  ;;  %v2013_v9 = vsub.f32 %v4239_v1, %v4354_v45  ;;  %v2499_v45 = vld [vmem:[%s4554_s5] ss:$0 sm:$0xff] }
 0x745   :  { %v1915_v41 = vpop.xlane.xlu0 %1914  ;;  %v2056_v5 = vmul.f32 %v2948_v54, %v2008_v21 }
 0x746   :  { %v2950_v46 = vpop.eup %2949  ;;  %v1994_v15 = vmax.f32 %v1978_v42, 0.0  ;;  %v1979_v27 = vsub.f32 %v1947_v4, %v1963_v25  ;;  %v1948_v56 = vmul.f32 0.03125, %v1915_v41 }
 0x747   :  { %v1917_v10 = vpop.xlane.xlu1 %1916  ;;  %v2057_v11 = vmul.f32 %v2950_v46, %v2009_v17  ;;  %v2078_v39 = vmul.f32 %v4297_v31, %v2056_v5 }
 0x748   :  { %v2952_v14 = vpop.eup %2951  ;;  %v2026_v48 = vadd.f32 1e-05, %v1994_v15  ;;  %v1995_v16 = vmax.f32 %v1979_v27, 0.0  ;;  %v1980_v35 = vsub.f32 %v1948_v56, %v1964_v2  ;;  %v1949_v43 = vmul.f32 0.03125, %v1917_v10 }
 0x749   :  { %v2054_v24 = vmul.f32 %v2952_v14, %v2006_v19  ;;  %v2079_v32 = vmul.f32 %v4297_v31, %v2057_v11  ;;  %v2098_v22 = vadd.f32 %v4307_v18, %v2078_v39 }
 0x74a   :  { %v2954_v47 = vpop.eup %2953  ;;  %2955 = vrsqrt.f32 %v2026_v48  ;;  %v2027_v57 = vadd.f32 1e-05, %v1995_v16  ;;  %v1996_v63 = vmax.f32 %v1980_v35, 0.0  ;;  %v1981_v50 = vsub.f32 %v1949_v43, %v1965_v53 }
 0x74b   :  { %v2055_v12 = vmul.f32 %v2954_v47, %v2007_v34  ;;  %v2076_v55 = vmul.f32 %v4297_v31, %v2054_v24  ;;  %v2099_v49 = vadd.f32 %v4307_v18, %v2079_v32 }
 0x74c   :  { %2957 = vrsqrt.f32 %v2027_v57  ;;  %v2028_v28 = vadd.f32 1e-05, %v1996_v63  ;;  %v1997_v23 = vmax.f32 %v1981_v50, 0.0 }
 0x74d   :  { %v2077_v58 = vmul.f32 %v4297_v31, %v2055_v12  ;;  %v2096_v37 = vadd.f32 %v4307_v18, %v2076_v55  ;;  %v2109_v26 = vpack.c.bf16 %v2099_v49, %v2098_v22 }
 0x74e   :  { %2959 = vrsqrt.f32 %v2028_v28  ;;  %v2029_v29 = vadd.f32 1e-05, %v1997_v23 }
 0x74f   :  { %v2097_v13 = vadd.f32 %v4307_v18, %v2077_v58 }
 0x750   :  { %2961 = vrsqrt.f32 %v2029_v29 }
 0x751   :  { %v2108_v51 = vpack.c.bf16 %v2097_v13, %v2096_v37 }
 0x753   :  { %2767 = vmatprep.mubr.bf16.mxu1 %v2108_v51 }
 0x754   :  { %v2956_v61 = vpop.eup %2955  ;;  %2768 = vmatmul.mubr.bf16.gmra.mrb[36].mxu1 %v2109_v26 }
 0x755   :  { %v2058_v59 = vmul.f32 %v2956_v61, %v2010_v3 }
 0x756   :  { %v2958_v36 = vpop.eup %2957 }
 0x757   :  { %v2059_v40 = vmul.f32 %v2958_v36, %v2011_v0  ;;  %v2080_v6 = vmul.f32 %v4297_v31, %v2058_v59 }
 0x758   :  { %v2960_v62 = vpop.eup %2959 }
 0x759   :  { %v2081_v7 = vmul.f32 %v4297_v31, %v2059_v40  ;;  %v2060_v8 = vmul.f32 %v2960_v62, %v2012_v60  ;;  %v2100_v52 = vadd.f32 %v4307_v18, %v2080_v6 }
 0x75a   :  { %v2962_v44 = vpop.eup %2961 }
 0x75b   :  { %v2101_v38 = vadd.f32 %v4307_v18, %v2081_v7  ;;  %v2061_v30 = vmul.f32 %v2962_v44, %v2013_v9  ;;  %v2082_v54 = vmul.f32 %v4297_v31, %v2060_v8 }
 0x75d   :  { %v2110_v25 = vpack.c.bf16 %v2101_v38, %v2100_v52  ;;  %v2083_v20 = vmul.f32 %v4297_v31, %v2061_v30  ;;  %v2102_v33 = vadd.f32 %v4307_v18, %v2082_v54 }
 0x75f   :  { %2771 = vmatprep.mubr.bf16.mxu1 %v2110_v25  ;;  %v2103_v42 = vadd.f32 %v4307_v18, %v2083_v20 }
 0x761   :  { %v2111_v1 = vpack.c.bf16 %v2103_v42, %v2102_v33 }
 0x763   :  { %2772 = vmatmul.mubr.bf16.gmra.mrb[40].mxu1 %v2111_v1 }
 0x807   :  { %v2761_v4 = vpop.f32.mrb[48].mxu0 }
 0x808   :  { %v2226_v21 = vadd.f32 %v2761_v4, %v2499_v45  ;;  %v2217_v17 = vpop.f32.mrb[49].mxu0 }
 0x809   :  { %v2762_v41 = vpop.f32.mrb[50].mxu0  ;;  %v2218_v15 = vadd.f32 %v2499_v45, %v2217_v17 }
 0x80a   :  { %v2229_v46 = vadd.f32 %v2762_v41, %v2499_v45  ;;  %2284 = vmax.xlane.f32.xlu0 %v2226_v21  ;;  %v2220_v2 = vpop.f32.mrb[51].mxu0 }
 0x80b   :  { %v2221_v31 = vadd.f32 %v2499_v45, %v2220_v2 }
 0x80c   :  { %2286 = vmax.xlane.f32.xlu1 %v2229_v46 }
 0x80e   :  { %2280 = vmax.xlane.f32.xlu0 %v2218_v15 }
 0x810   :  { %2282 = vmax.xlane.f32.xlu1 %v2221_v31 }
 0x817   :  { %v2765_v27 = vpop.f32.mrb[32].mxu1 }
 0x818   :  { %v2242_v18 = vadd.f32 %v2765_v27, %v2499_v45  ;;  %v2233_v56 = vpop.f32.mrb[33].mxu1 }
 0x819   :  { %v2766_v19 = vpop.f32.mrb[34].mxu1  ;;  %v4397_v5 = vadd.f32 %v2499_v45, %v2233_v56 }
 0x81a   :  { %v2245_v53 = vadd.f32 %v2766_v19, %v2499_v45  ;;  %2292 = vmax.xlane.f32.xlu0 %v2242_v18  ;;  %v2236_v10 = vpop.f32.mrb[35].mxu1 }
 0x81b   :  { %v4399_v11 = vadd.f32 %v2499_v45, %v2236_v10 }
 0x81c   :  { %2294 = vmax.xlane.f32.xlu1 %v2245_v53 }
 0x81e   :  { %2288 = vmax.xlane.f32.xlu0 %v4397_v5 }
 0x820   :  { %2290 = vmax.xlane.f32.xlu1 %v4399_v11 }
 0x827   :  { %v2769_v14 = vpop.f32.mrb[36].mxu1 }
 0x828   :  { %v4403_v48 = vadd.f32 %v2769_v14, %v2499_v45  ;;  %v2249_v16 = vpop.f32.mrb[37].mxu1 }
 0x829   :  { %v2770_v35 = vpop.f32.mrb[38].mxu1  ;;  %v4408_v24 = vadd.f32 %v2499_v45, %v2249_v16 }
 0x82a   :  { %v4405_v43 = vadd.f32 %v2770_v35, %v2499_v45  ;;  %2300 = vmax.xlane.f32.xlu0 %v4403_v48  ;;  %v2252_v34 = vpop.f32.mrb[39].mxu1 }
 0x82b   :  { %v4411_v32 = vadd.f32 %v2499_v45, %v2252_v34 }
 0x82c   :  { %2302 = vmax.xlane.f32.xlu1 %v4405_v43 }
 0x82e   :  { %2296 = vmax.xlane.f32.xlu0 %v4408_v24 }
 0x830   :  { %2298 = vmax.xlane.f32.xlu1 %v4411_v32 }
 0x836   :  { %v2773_v47 = vpop.f32.mrb[40].mxu1 }
 0x837   :  { %v2265_v57 = vpop.f32.mrb[41].mxu1  ;;  %v4420_v28 = vadd.f32 %v2773_v47, %v2499_v45 }
 0x838   :  { %v4415_v63 = vadd.f32 %v2499_v45, %v2265_v57  ;;  %v2774_v50 = vpop.f32.mrb[42].mxu1 }
 0x839   :  { %v2268_v12 = vpop.f32.mrb[43].mxu1  ;;  %v4423_v23 = vadd.f32 %v2774_v50, %v2499_v45 }
 0x83a   :  { %v4417_v55 = vadd.f32 %v2499_v45, %v2268_v12  ;;  %2304 = vmax.xlane.f32.xlu0 %v4415_v63 }
 0x83c   :  { %2306 = vmax.xlane.f32.xlu1 %v4417_v55 }
 0x83e   :  { %2308 = vmax.xlane.f32.xlu0 %v4420_v28 }
 0x840   :  { %2310 = vmax.xlane.f32.xlu1 %v4423_v23 }
 0x897   :  { %v2285_v39 = vpop.xlane.xlu0 %2284 }
 0x898   :  { %v2314_v58 = vsub.f32 %v2226_v21, %v2285_v39 }
 0x899   :  { %v2287_v29 = vpop.xlane.xlu1 %2286 }
 0x89a   :  { %v2332_v49 = vmul.f32 1.442695, %v2314_v58  ;;  %v2315_v37 = vsub.f32 %v2229_v46, %v2287_v29 }
 0x89b   :  { %v2281_v13 = vpop.xlane.xlu0 %2280 }
 0x89c   :  { %2963 = vpow2.f32 %v2332_v49  ;;  %v2334_v22 = vmul.f32 1.442695, %v2315_v37  ;;  %v2312_v51 = vsub.f32 %v2218_v15, %v2281_v13 }
 0x89d   :  { %v2283_v26 = vpop.xlane.xlu1 %2282 }
 0x89e   :  { %2965 = vpow2.f32 %v2334_v22  ;;  %v2328_v3 = vmul.f32 1.442695, %v2312_v51  ;;  %v2313_v61 = vsub.f32 %v2221_v31, %v2283_v26 }
 0x8a0   :  { %2967 = vpow2.f32 %v2328_v3  ;;  %v2330_v0 = vmul.f32 1.442695, %v2313_v61 }
 0x8a2   :  { %2969 = vpow2.f32 %v2330_v0 }
 0x8a6   :  { %v4427_v59 = vpop.eup %2963 }
 0x8a7   :  { %v2293_v36 = vpop.xlane.xlu0 %2292  ;;  %2364 = vadd.xlane.f32.xlu0 %v4427_v59 }
 0x8a8   :  { %v4430_v60 = vpop.eup %2965  ;;  %v2318_v40 = vsub.f32 %v2242_v18, %v2293_v36 }
 0x8a9   :  { %2366 = vadd.xlane.f32.xlu1 %v4430_v60  ;;  %v2295_v6 = vpop.xlane.xlu1 %2294 }
 0x8aa   :  { %v4433_v62 = vpop.eup %2967  ;;  %v2340_v9 = vmul.f32 1.442695, %v2318_v40  ;;  %v2319_v7 = vsub.f32 %v2245_v53, %v2295_v6 }
 0x8ab   :  { %v2289_v8 = vpop.xlane.xlu0 %2288  ;;  %2360 = vadd.xlane.f32.xlu0 %v4433_v62 }
 0x8ac   :  { %v4436_v44 = vpop.eup %2969  ;;  %2971 = vpow2.f32 %v2340_v9  ;;  %v2342_v52 = vmul.f32 1.442695, %v2319_v7  ;;  %v2316_v38 = vsub.f32 %v4397_v5, %v2289_v8 }
 0x8ad   :  { %2362 = vadd.xlane.f32.xlu1 %v4436_v44  ;;  %v2291_v30 = vpop.xlane.xlu1 %2290 }
 0x8ae   :  { %2973 = vpow2.f32 %v2342_v52  ;;  %v2336_v54 = vmul.f32 1.442695, %v2316_v38  ;;  %v2317_v25 = vsub.f32 %v4399_v11, %v2291_v30 }
 0x8b0   :  { %2975 = vpow2.f32 %v2336_v54  ;;  %v2338_v20 = vmul.f32 1.442695, %v2317_v25 }
 0x8b2   :  { %2977 = vpow2.f32 %v2338_v20 }
 0x8b6   :  { %v4441_v33 = vpop.eup %2971 }
 0x8b7   :  { %v2301_v42 = vpop.xlane.xlu0 %2300  ;;  %2372 = vadd.xlane.f32.xlu0 %v4441_v33 }
 0x8b8   :  { %v4444_v1 = vpop.eup %2973  ;;  %v2322_v45 = vsub.f32 %v4403_v48, %v2301_v42 }
 0x8b9   :  { %2374 = vadd.xlane.f32.xlu1 %v4444_v1  ;;  %v2303_v4 = vpop.xlane.xlu1 %2302 }
 0x8ba   :  { %v4448_v21 = vpop.eup %2975  ;;  %v2348_v17 = vmul.f32 1.442695, %v2322_v45  ;;  %v2323_v41 = vsub.f32 %v4405_v43, %v2303_v4 }
 0x8bb   :  { %v2297_v46 = vpop.xlane.xlu0 %2296  ;;  %2368 = vadd.xlane.f32.xlu0 %v4448_v21 }
 0x8bc   :  { %v4452_v2 = vpop.eup %2977  ;;  %2979 = vpow2.f32 %v2348_v17  ;;  %v2350_v15 = vmul.f32 1.442695, %v2323_v41  ;;  %v2320_v31 = vsub.f32 %v4408_v24, %v2297_v46 }
 0x8bd   :  { %2370 = vadd.xlane.f32.xlu1 %v4452_v2  ;;  %v2299_v27 = vpop.xlane.xlu1 %2298 }
 0x8be   :  { %2981 = vpow2.f32 %v2350_v15  ;;  %v2344_v18 = vmul.f32 1.442695, %v2320_v31  ;;  %v2321_v56 = vsub.f32 %v4411_v32, %v2299_v27 }
 0x8c0   :  { %2983 = vpow2.f32 %v2344_v18  ;;  %v2346_v19 = vmul.f32 1.442695, %v2321_v56 }
 0x8c2   :  { %2985 = vpow2.f32 %v2346_v19 }
 0x8c6   :  { %v4457_v53 = vpop.eup %2979 }
 0x8c7   :  { %2380 = vadd.xlane.f32.xlu0 %v4457_v53  ;;  %v2305_v10 = vpop.xlane.xlu0 %2304 }
 0x8c8   :  { %v4460_v5 = vpop.eup %2981  ;;  %v2324_v11 = vsub.f32 %v4415_v63, %v2305_v10 }
 0x8c9   :  { %2382 = vadd.xlane.f32.xlu1 %v4460_v5  ;;  %v2307_v14 = vpop.xlane.xlu1 %2306 }
 0x8ca   :  { %v4464_v48 = vpop.eup %2983  ;;  %v2352_v16 = vmul.f32 1.442695, %v2324_v11  ;;  %v2325_v35 = vsub.f32 %v4417_v55, %v2307_v14 }
 0x8cb   :  { %2376 = vadd.xlane.f32.xlu0 %v4464_v48  ;;  %v2309_v43 = vpop.xlane.xlu0 %2308 }
 0x8cc   :  { %v4468_v34 = vpop.eup %2985  ;;  %2987 = vpow2.f32 %v2352_v16  ;;  %v2354_v24 = vmul.f32 1.442695, %v2325_v35  ;;  %v2326_v32 = vsub.f32 %v4420_v28, %v2309_v43 }
 0x8cd   :  { %2378 = vadd.xlane.f32.xlu1 %v4468_v34  ;;  %v2311_v47 = vpop.xlane.xlu1 %2310 }
 0x8ce   :  { %2989 = vpow2.f32 %v2354_v24  ;;  %v2356_v57 = vmul.f32 1.442695, %v2326_v32  ;;  %v2327_v63 = vsub.f32 %v4423_v23, %v2311_v47 }
 0x8d0   :  { %2991 = vpow2.f32 %v2356_v57  ;;  %v2358_v50 = vmul.f32 1.442695, %v2327_v63 }
 0x8d2   :  { %2993 = vpow2.f32 %v2358_v50 }
 0x8d6   :  { %v4473_v12 = vpop.eup %2987 }
 0x8d7   :  { %2384 = vadd.xlane.f32.xlu0 %v4473_v12 }
 0x8d8   :  { %v4476_v55 = vpop.eup %2989 }
 0x8d9   :  { %2386 = vadd.xlane.f32.xlu1 %v4476_v55 }
 0x8da   :  { %v4479_v39 = vpop.eup %2991 }
 0x8db   :  { %2388 = vadd.xlane.f32.xlu0 %v4479_v39 }
 0x8dc   :  { %v4482_v28 = vpop.eup %2993 }
 0x8dd   :  { %2390 = vadd.xlane.f32.xlu1 %v4482_v28 }
 0x934   :  { %v2365_v23 = vpop.xlane.xlu0 %2364 }
 0x935   :  { %2995 = vrcp.f32 %v2365_v23 }
 0x936   :  { %v2367_v58 = vpop.xlane.xlu1 %2366 }
 0x937   :  { %2997 = vrcp.f32 %v2367_v58 }
 0x938   :  { %v2361_v29 = vpop.xlane.xlu0 %2360 }
 0x939   :  { %2999 = vrcp.f32 %v2361_v29 }
 0x93a   :  { %v2363_v49 = vpop.xlane.xlu1 %2362 }
 0x93b   :  { %3001 = vrcp.f32 %v2363_v49 }
 0x93f   :  { %v2996_v37 = vpop.eup %2995 }
 0x940   :  { %v2410_v13 = vmul.f32 %v2996_v37, %v4427_v59 }
 0x941   :  { %v2998_v22 = vpop.eup %2997 }
 0x942   :  { %2426 = vst [vmem:[%s4555_s6 + $0x10] sm:$0xff] %v2410_v13  ;;  %v2411_v51 = vmul.f32 %v2998_v22, %v4430_v60 }
 0x943   :  { %v3000_v26 = vpop.eup %2999 }
 0x944   :  { %2427 = vst [vmem:[%s4555_s6 + $0x18] sm:$0xff] %v2411_v51  ;;  %v2408_v3 = vmul.f32 %v3000_v26, %v4433_v62  ;;  %v2373_v61 = vpop.xlane.xlu0 %2372 }
 0x945   :  { %v3002_v0 = vpop.eup %3001  ;;  %3003 = vrcp.f32 %v2373_v61 }
 0x946   :  { %2424 = vst [vmem:[%s4555_s6] sm:$0xff] %v2408_v3  ;;  %v2409_v59 = vmul.f32 %v3002_v0, %v4436_v44  ;;  %v2375_v36 = vpop.xlane.xlu1 %2374 }
 0x947   :  { %3005 = vrcp.f32 %v2375_v36 }
 0x948   :  { %2425 = vst [vmem:[%s4555_s6 + $0x8] sm:$0xff] %v2409_v59  ;;  %v2369_v60 = vpop.xlane.xlu0 %2368 }
 0x949   :  { %3007 = vrcp.f32 %v2369_v60 }
 0x94a   :  { %v2371_v40 = vpop.xlane.xlu1 %2370 }
 0x94b   :  { %3009 = vrcp.f32 %v2371_v40 }
 0x94f   :  { %v3004_v6 = vpop.eup %3003 }
 0x950   :  { %v2414_v62 = vmul.f32 %v3004_v6, %v4441_v33 }
 0x951   :  { %v3006_v9 = vpop.eup %3005 }
 0x952   :  { %2430 = vst [vmem:[%s4555_s6 + $0x30] sm:$0xff] %v2414_v62  ;;  %v2415_v7 = vmul.f32 %v3006_v9, %v4444_v1 }
 0x953   :  { %v3008_v8 = vpop.eup %3007 }
 0x954   :  { %2431 = vst [vmem:[%s4555_s6 + $0x38] sm:$0xff] %v2415_v7  ;;  %v2412_v44 = vmul.f32 %v3008_v8, %v4448_v21  ;;  %v2381_v52 = vpop.xlane.xlu0 %2380 }
 0x955   :  { %v3010_v38 = vpop.eup %3009  ;;  %3011 = vrcp.f32 %v2381_v52 }
 0x956   :  { %2428 = vst [vmem:[%s4555_s6 + $0x20] sm:$0xff] %v2412_v44  ;;  %v2413_v30 = vmul.f32 %v3010_v38, %v4452_v2  ;;  %v2383_v54 = vpop.xlane.xlu1 %2382 }
 0x957   :  { %3013 = vrcp.f32 %v2383_v54 }
 0x958   :  { %2429 = vst [vmem:[%s4555_s6 + $0x28] sm:$0xff] %v2413_v30  ;;  %v2377_v25 = vpop.xlane.xlu0 %2376 }
 0x959   :  { %3015 = vrcp.f32 %v2377_v25 }
 0x95a   :  { %v2379_v20 = vpop.xlane.xlu1 %2378 }
 0x95b   :  { %3017 = vrcp.f32 %v2379_v20 }
 0x95f   :  { %v3012_v33 = vpop.eup %3011 }
 0x960   :  { %v2418_v42 = vmul.f32 %v3012_v33, %v4457_v53 }
 0x961   :  { %v3014_v1 = vpop.eup %3013 }
 0x962   :  { %2434 = vst [vmem:[%s4555_s6 + $0x50] sm:$0xff] %v2418_v42  ;;  %v2419_v45 = vmul.f32 %v3014_v1, %v4460_v5 }
 0x963   :  { %v3016_v4 = vpop.eup %3015 }
 0x964   :  { %2435 = vst [vmem:[%s4555_s6 + $0x58] sm:$0xff] %v2419_v45  ;;  %v2416_v21 = vmul.f32 %v3016_v4, %v4464_v48  ;;  %v2385_v17 = vpop.xlane.xlu0 %2384 }
 0x965   :  { %v3018_v41 = vpop.eup %3017  ;;  %3019 = vrcp.f32 %v2385_v17 }
 0x966   :  { %2432 = vst [vmem:[%s4555_s6 + $0x40] sm:$0xff] %v2416_v21  ;;  %v2417_v46 = vmul.f32 %v3018_v41, %v4468_v34  ;;  %v2387_v2 = vpop.xlane.xlu1 %2386 }
 0x967   :  { %3021 = vrcp.f32 %v2387_v2 }
 0x968   :  { %2433 = vst [vmem:[%s4555_s6 + $0x48] sm:$0xff] %v2417_v46  ;;  %v2389_v15 = vpop.xlane.xlu0 %2388 }
 0x969   :  { %3023 = vrcp.f32 %v2389_v15 }
 0x96a   :  { %v2391_v31 = vpop.xlane.xlu1 %2390 }
 0x96b   :  { %3025 = vrcp.f32 %v2391_v31 }
 0x96f   :  { %v3020_v27 = vpop.eup %3019 }
 0x970   :  { %v2420_v18 = vmul.f32 %v3020_v27, %v4473_v12 }
 0x971   :  { %v3022_v56 = vpop.eup %3021 }
 0x972   :  { %2436 = vst [vmem:[%s4555_s6 + $0x60] sm:$0xff] %v2420_v18  ;;  %v2421_v19 = vmul.f32 %v3022_v56, %v4476_v55 }
 0x973   :  { %v3024_v53 = vpop.eup %3023 }
 0x974   :  { %2437 = vst [vmem:[%s4555_s6 + $0x68] sm:$0xff] %v2421_v19  ;;  %v2422_v10 = vmul.f32 %v3024_v53, %v4479_v39 }
 0x975   :  { %v3026_v5 = vpop.eup %3025 }
 0x976   :  { %2438 = vst [vmem:[%s4555_s6 + $0x70] sm:$0xff] %v2422_v10  ;;  %v2423_v11 = vmul.f32 %v3026_v5, %v4482_v28 }
 0x978   :  { %2439 = vst [vmem:[%s4555_s6 + $0x78] sm:$0xff] %v2423_v11 }
 0x979   :  { %2444 = vsyncpa [#allocation3], 1 }

</bundles_post_ra>
